<compile_context>
chip_gen: v6e
topology: v6e:2x2x1
jax: 0.10.0
libtpu: 0.0.40
codegen_flags: <defaults>
</compile_context>

<pallas_src>
import numpy as np
import jax
import jax.numpy as jnp
from jax import lax
from jax.experimental import pallas as pl
from jax.experimental.pallas import tpu as pltpu

HIDDEN_DIM = 32
INPUT_DIM = 1
NUM_LAYERS = 2
OUTPUT_DIM = 1


def _lstm_kernel(x_ref,        # (T, B, 1)  raw inputs (I = 1), f32
                 wih0_ref,     # (1, 4H)    W_ih_l0^T row, f32 (VPU operand)
                 b0_ref,       # (1, 4H)    b_ih_l0 + b_hh_l0, f32
                 wcomb_ref,    # (2H, 8H)   [[W_hh0^T, W_ih1^T], [0, W_hh1^T]], bf16 (MXU)
                 b1_ref,       # (1, 4H)    b_ih_l1 + b_hh_l1, f32
                 out_ref):     # (B, H)     final layer-1 hidden state, f32
    T, B, _ = x_ref.shape
    H = out_ref.shape[1]
    G = 4 * H

    wih0 = wih0_ref[...]          # f32
    b0 = b0_ref[...]              # f32
    wcomb = wcomb_ref[...]        # bf16 (stays resident; 4 vregs)
    b1 = b1_ref[...]              # f32

    def activate(gates):
        # Full-vreg activations (2 EUP pushes per cell), then cheap lane slices.
        sig = jax.nn.sigmoid(gates)
        tnh = jnp.tanh(gates)
        i = sig[:, 0 * H:1 * H]
        f = sig[:, 1 * H:2 * H]
        g = tnh[:, 2 * H:3 * H]
        o = sig[:, 3 * H:4 * H]
        return i, f, g, o

    def step(t, carry):
        h1, c0, c1, rec0 = carry   # rec0 = h0(t-1) @ W_hh0^T (carried from prev combined dot)

        # ---- Layer 0, step t: I=1 input projection is a VPU broadcast multiply.
        x_t = x_ref[t]                                   # (B, 1)
        gates0 = x_t * wih0 + b0 + rec0                  # (B, 4H), f32
        i0, f0, g0, o0 = activate(gates0)
        c0n = f0 * c0 + i0 * g0
        h0n = o0 * jnp.tanh(c0n)

        # ---- ONE combined dual-layer matmul: [h0(t), h1(t-1)] @ W_comb  (B,2H)x(2H,8H).
        # Left 4H lanes  -> layer-0 recurrent term for step t+1 (rec0 for next iter).
        # Right 4H lanes -> layer-1 gate pre-bias for step t.
        hcat = jnp.concatenate([h0n, h1], axis=1).astype(wcomb.dtype)   # (B, 2H) bf16
        comb = jnp.dot(hcat, wcomb, preferred_element_type=jnp.float32)  # (B, 8H) f32
        rec0n = comb[:, :G]                              # vreg-aligned slice (G = 128)
        gates1 = comb[:, G:] + b1

        # ---- Layer 1, step t.
        i1, f1, g1, o1 = activate(gates1)
        c1n = f1 * c1 + i1 * g1
        h1n = o1 * jnp.tanh(c1n)

        return (h1n, c0n, c1n, rec0n)

    zeros_h = jnp.zeros((B, H), jnp.float32)
    zeros_g = jnp.zeros((B, G), jnp.float32)    # h0(-1) = 0  =>  rec0(0) = 0
    # T is small & static: fully unroll so layer-0(t+1) overlaps layer-1(t).
    # (Cap unroll at 2-4 if T grows to avoid vreg spills / i-mem bloat.)
    h1, c0, c1, rec0 = lax.fori_loop(0, T, step,
                                     (zeros_h, zeros_h, zeros_h, zeros_g),
                                     unroll=True)

    out_ref[...] = h1.astype(out_ref.dtype)


def prepare_params(params):
    """One-time weight prep (hoisted out of the per-call forward path)."""
    H = HIDDEN_DIM
    G = 4 * H
    wih0_row = params["w_ih_l0"].T.reshape(1, G).astype(jnp.float32)          # (1, 4H)
    b0 = (params["b_ih_l0"] + params["b_hh_l0"]).reshape(1, G).astype(jnp.float32)
    # Combined dual-layer weight:  rows 0..H-1 multiply h0(t), rows H..2H-1 multiply h1(t-1).
    top = jnp.concatenate([params["w_hh_l0"].T, params["w_ih_l1"].T], axis=1)   # (H, 8H)
    bot = jnp.concatenate([jnp.zeros((H, G), jnp.float32), params["w_hh_l1"].T], axis=1)
    w_comb = jnp.concatenate([top, bot], axis=0).astype(jnp.bfloat16)           # (2H, 8H)
    b1 = (params["b_ih_l1"] + params["b_hh_l1"]).reshape(1, G).astype(jnp.float32)
    return {
        "wih0_row": wih0_row, "b0": b0, "w_comb": w_comb, "b1": b1,
        "w_fc_t": params["w_fc"].T.astype(jnp.float32),   # (H, O)
        "b_fc": params["b_fc"].astype(jnp.float32),
    }


def lstm_forward(x, prepped):
    """x: (B, T, INPUT_DIM) float32 (batch_first, like the PyTorch module)."""
    B, T, _ = x.shape
    H = HIDDEN_DIM

    x_tm = jnp.transpose(x, (1, 0, 2)).astype(jnp.float32)    # (T, B, 1) — time-major

    vmem_spec = pl.BlockSpec(memory_space=pltpu.MemorySpace.VMEM)

    h_last = pl.pallas_call(
        _lstm_kernel,
        out_shape=jax.ShapeDtypeStruct((B, H), jnp.float32),
        in_specs=[vmem_spec] * 5,
        out_specs=vmem_spec,
    )(x_tm, prepped["wih0_row"], prepped["b0"], prepped["w_comb"], prepped["b1"])

    # Tiny (B,32)@(32,1) output head in plain XLA (avoids 1-lane masked store in-kernel).
    return h_last @ prepped["w_fc_t"] + prepped["b_fc"]       # (B, OUTPUT_DIM)


def _reference_forward(x, params):
    """Pure-JAX f32 reference replicating torch.nn.LSTM + Linear semantics."""
    B, T, _ = x.shape
    H = HIDDEN_DIM

    def cell(x_t, h, c, w_ih, w_hh, b_ih, b_hh):
        gates = x_t @ w_ih.T + b_ih + h @ w_hh.T + b_hh
        i = jax.nn.sigmoid(gates[:, 0 * H:1 * H])
        f = jax.nn.sigmoid(gates[:, 1 * H:2 * H])
        g = jnp.tanh(gates[:, 2 * H:3 * H])
        o = jax.nn.sigmoid(gates[:, 3 * H:4 * H])
        c = f * c + i * g
        h = o * jnp.tanh(c)
        return h, c

    h0 = c0 = h1 = c1 = jnp.zeros((B, H), jnp.float32)
    for t in range(T):
        h0, c0 = cell(x[:, t, :], h0, c0,
                      params["w_ih_l0"], params["w_hh_l0"],
                      params["b_ih_l0"], params["b_hh_l0"])
        h1, c1 = cell(h0, h1, c1,
                      params["w_ih_l1"], params["w_hh_l1"],
                      params["b_ih_l1"], params["b_hh_l1"])
    return h1 @ params["w_fc"].T + params["b_fc"]


def _init_params(key):
    """Deterministic init mimicking PyTorch's U(-1/sqrt(H), 1/sqrt(H))."""
    H, I, O = HIDDEN_DIM, INPUT_DIM, OUTPUT_DIM
    bound = 1.0 / np.sqrt(H)
    shapes = {
        "w_ih_l0": (4 * H, I), "w_hh_l0": (4 * H, H),
        "b_ih_l0": (4 * H,),   "b_hh_l0": (4 * H,),
        "w_ih_l1": (4 * H, H), "w_hh_l1": (4 * H, H),
        "b_ih_l1": (4 * H,),   "b_hh_l1": (4 * H,),
        "w_fc": (O, H),        "b_fc": (O,),
    }
    params = {}
    for name, shape in shapes.items():
        key, sub = jax.random.split(key)
        params[name] = jax.random.uniform(sub, shape, jnp.float32,
                                          minval=-bound, maxval=bound)
    return params


if __name__ == "__main__":
    key = jax.random.PRNGKey(0)
    pkey, xkey = jax.random.split(key)
    params = _init_params(pkey)

    B, T = 2, 8
    x = jax.random.normal(xkey, (B, T, INPUT_DIM), jnp.float32)

    prepped = prepare_params(params)            # one-time weight prep (not per call)
    fwd = jax.jit(lstm_forward)                 # whole forward jitted: one dispatch + kernel

    out = fwd(x, prepped)
    out = jax.block_until_ready(out)

    ref = _reference_forward(x, params)
    # bf16 MXU operands (f32 accumulation & state) -> relaxed tolerance vs the f32 reference.
    np.testing.assert_allclose(np.asarray(out), np.asarray(ref), rtol=2e-2, atol=2e-2)

    print("KERNEL_OK")
</pallas_src>

<mosaic_0001>
module attributes {stable_mosaic.version = 11 : i64} {
  func.func @_lstm_kernel(%arg0: memref<8x2x1xf32, #tpu.memory_space<vmem>>, %arg1: memref<1x128xf32, #tpu.memory_space<vmem>>, %arg2: memref<1x128xf32, #tpu.memory_space<vmem>>, %arg3: memref<64x256xbf16, #tpu.memory_space<vmem>>, %arg4: memref<1x128xf32, #tpu.memory_space<vmem>>, %arg5: memref<2x32xf32, #tpu.memory_space<vmem>>) attributes {dimension_semantics = [], scalar_prefetch = 0 : i64, scratch_operands = 0 : i64, tpu.core_type = #tpu.core_type<tc>} {
    %c0 = arith.constant 0 : index
    %c0_0 = arith.constant 0 : index
    %0 = vector.load %arg1[%c0, %c0_0] : memref<1x128xf32, #tpu.memory_space<vmem>>, vector<1x128xf32>
    %c0_1 = arith.constant 0 : index
    %c0_2 = arith.constant 0 : index
    %1 = vector.load %arg2[%c0_1, %c0_2] : memref<1x128xf32, #tpu.memory_space<vmem>>, vector<1x128xf32>
    %c0_3 = arith.constant 0 : index
    %c0_4 = arith.constant 0 : index
    %2 = vector.load %arg3[%c0_3, %c0_4] : memref<64x256xbf16, #tpu.memory_space<vmem>>, vector<64x256xbf16>
    %c0_5 = arith.constant 0 : index
    %c0_6 = arith.constant 0 : index
    %3 = vector.load %arg4[%c0_5, %c0_6] : memref<1x128xf32, #tpu.memory_space<vmem>>, vector<1x128xf32>
    %cst = arith.constant 0.000000e+00 : f32
    %4 = vector.broadcast %cst : f32 to vector<2x32xf32>
    %cst_7 = arith.constant 0.000000e+00 : f32
    %5 = vector.broadcast %cst_7 : f32 to vector<2x128xf32>
    %c0_i32 = arith.constant 0 : i32
    %6 = arith.index_cast %c0_i32 : i32 to index
    %c0_8 = arith.constant 0 : index
    %c0_9 = arith.constant 0 : index
    %7 = vector.load %arg0[%6, %c0_8, %c0_9] : memref<8x2x1xf32, #tpu.memory_space<vmem>>, vector<1x2x1xf32>
    %8 = vector.shape_cast %7 : vector<1x2x1xf32> to vector<2x1xf32>
    %9 = vector.broadcast %8 : vector<2x1xf32> to vector<2x128xf32>
    %10 = vector.broadcast %0 : vector<1x128xf32> to vector<2x128xf32>
    %11 = arith.mulf %9, %10 : vector<2x128xf32>
    %12 = vector.broadcast %1 : vector<1x128xf32> to vector<2x128xf32>
    %13 = arith.addf %11, %12 : vector<2x128xf32>
    %14 = arith.addf %13, %5 : vector<2x128xf32>
    %15 = arith.negf %14 : vector<2x128xf32>
    %16 = math.exp %15 : vector<2x128xf32>
    %cst_10 = arith.constant 1.000000e+00 : f32
    %17 = vector.broadcast %cst_10 : f32 to vector<2x128xf32>
    %18 = arith.addf %17, %16 : vector<2x128xf32>
    %19 = arith.divf %17, %18 : vector<2x128xf32>
    %20 = math.tanh %14 : vector<2x128xf32>
    %21 = vector.extract_strided_slice %19 {offsets = [0, 0], sizes = [2, 32], strides = [1, 1]} : vector<2x128xf32> to vector<2x32xf32>
    %22 = vector.extract_strided_slice %19 {offsets = [0, 32], sizes = [2, 32], strides = [1, 1]} : vector<2x128xf32> to vector<2x32xf32>
    %23 = vector.extract_strided_slice %20 {offsets = [0, 64], sizes = [2, 32], strides = [1, 1]} : vector<2x128xf32> to vector<2x32xf32>
    %24 = vector.extract_strided_slice %19 {offsets = [0, 96], sizes = [2, 32], strides = [1, 1]} : vector<2x128xf32> to vector<2x32xf32>
    %25 = arith.mulf %22, %4 : vector<2x32xf32>
    %26 = arith.mulf %21, %23 : vector<2x32xf32>
    %27 = arith.addf %25, %26 : vector<2x32xf32>
    %28 = math.tanh %27 : vector<2x32xf32>
    %29 = arith.mulf %24, %28 : vector<2x32xf32>
    %30 = tpu.concatenate %29, %4 in 1 : vector<2x32xf32>, vector<2x32xf32> -> vector<2x64xf32>
    %31 = arith.truncf %30 : vector<2x64xf32> to vector<2x64xbf16>
    %cst_11 = arith.constant dense<0.000000e+00> : vector<2x256xf32>
    %32 = tpu.matmul %31, %2, %cst_11 {dimension_numbers = #tpu.dot_dimension_numbers<[1], [0], [0], [1], [0, 0, 1, 1], [], []>} : vector<2x64xbf16>, vector<64x256xbf16>, vector<2x256xf32> -> vector<2x256xf32>
    %33 = vector.extract_strided_slice %32 {offsets = [0, 0], sizes = [2, 128], strides = [1, 1]} : vector<2x256xf32> to vector<2x128xf32>
    %34 = vector.extract_strided_slice %32 {offsets = [0, 128], sizes = [2, 128], strides = [1, 1]} : vector<2x256xf32> to vector<2x128xf32>
    %35 = vector.broadcast %3 : vector<1x128xf32> to vector<2x128xf32>
    %36 = arith.addf %34, %35 : vector<2x128xf32>
    %37 = arith.negf %36 : vector<2x128xf32>
    %38 = math.exp %37 : vector<2x128xf32>
    %cst_12 = arith.constant 1.000000e+00 : f32
    %39 = vector.broadcast %cst_12 : f32 to vector<2x128xf32>
    %40 = arith.addf %39, %38 : vector<2x128xf32>
    %41 = arith.divf %39, %40 : vector<2x128xf32>
    %42 = math.tanh %36 : vector<2x128xf32>
    %43 = vector.extract_strided_slice %41 {offsets = [0, 0], sizes = [2, 32], strides = [1, 1]} : vector<2x128xf32> to vector<2x32xf32>
    %44 = vector.extract_strided_slice %41 {offsets = [0, 32], sizes = [2, 32], strides = [1, 1]} : vector<2x128xf32> to vector<2x32xf32>
    %45 = vector.extract_strided_slice %42 {offsets = [0, 64], sizes = [2, 32], strides = [1, 1]} : vector<2x128xf32> to vector<2x32xf32>
    %46 = vector.extract_strided_slice %41 {offsets = [0, 96], sizes = [2, 32], strides = [1, 1]} : vector<2x128xf32> to vector<2x32xf32>
    %47 = arith.mulf %44, %4 : vector<2x32xf32>
    %48 = arith.mulf %43, %45 : vector<2x32xf32>
    %49 = arith.addf %47, %48 : vector<2x32xf32>
    %50 = math.tanh %49 : vector<2x32xf32>
    %51 = arith.mulf %46, %50 : vector<2x32xf32>
    %c1_i32 = arith.constant 1 : i32
    %52 = arith.index_cast %c1_i32 : i32 to index
    %c0_13 = arith.constant 0 : index
    %c0_14 = arith.constant 0 : index
    %53 = vector.load %arg0[%52, %c0_13, %c0_14] : memref<8x2x1xf32, #tpu.memory_space<vmem>>, vector<1x2x1xf32>
    %54 = vector.shape_cast %53 : vector<1x2x1xf32> to vector<2x1xf32>
    %55 = vector.broadcast %54 : vector<2x1xf32> to vector<2x128xf32>
    %56 = vector.broadcast %0 : vector<1x128xf32> to vector<2x128xf32>
    %57 = arith.mulf %55, %56 : vector<2x128xf32>
    %58 = vector.broadcast %1 : vector<1x128xf32> to vector<2x128xf32>
    %59 = arith.addf %57, %58 : vector<2x128xf32>
    %60 = arith.addf %59, %33 : vector<2x128xf32>
    %61 = arith.negf %60 : vector<2x128xf32>
    %62 = math.exp %61 : vector<2x128xf32>
    %cst_15 = arith.constant 1.000000e+00 : f32
    %63 = vector.broadcast %cst_15 : f32 to vector<2x128xf32>
    %64 = arith.addf %63, %62 : vector<2x128xf32>
    %65 = arith.divf %63, %64 : vector<2x128xf32>
    %66 = math.tanh %60 : vector<2x128xf32>
    %67 = vector.extract_strided_slice %65 {offsets = [0, 0], sizes = [2, 32], strides = [1, 1]} : vector<2x128xf32> to vector<2x32xf32>
    %68 = vector.extract_strided_slice %65 {offsets = [0, 32], sizes = [2, 32], strides = [1, 1]} : vector<2x128xf32> to vector<2x32xf32>
    %69 = vector.extract_strided_slice %66 {offsets = [0, 64], sizes = [2, 32], strides = [1, 1]} : vector<2x128xf32> to vector<2x32xf32>
    %70 = vector.extract_strided_slice %65 {offsets = [0, 96], sizes = [2, 32], strides = [1, 1]} : vector<2x128xf32> to vector<2x32xf32>
    %71 = arith.mulf %68, %27 : vector<2x32xf32>
    %72 = arith.mulf %67, %69 : vector<2x32xf32>
    %73 = arith.addf %71, %72 : vector<2x32xf32>
    %74 = math.tanh %73 : vector<2x32xf32>
    %75 = arith.mulf %70, %74 : vector<2x32xf32>
    %76 = tpu.concatenate %75, %51 in 1 : vector<2x32xf32>, vector<2x32xf32> -> vector<2x64xf32>
    %77 = arith.truncf %76 : vector<2x64xf32> to vector<2x64xbf16>
    %cst_16 = arith.constant dense<0.000000e+00> : vector<2x256xf32>
    %78 = tpu.matmul %77, %2, %cst_16 {dimension_numbers = #tpu.dot_dimension_numbers<[1], [0], [0], [1], [0, 0, 1, 1], [], []>} : vector<2x64xbf16>, vector<64x256xbf16>, vector<2x256xf32> -> vector<2x256xf32>
    %79 = vector.extract_strided_slice %78 {offsets = [0, 0], sizes = [2, 128], strides = [1, 1]} : vector<2x256xf32> to vector<2x128xf32>
    %80 = vector.extract_strided_slice %78 {offsets = [0, 128], sizes = [2, 128], strides = [1, 1]} : vector<2x256xf32> to vector<2x128xf32>
    %81 = vector.broadcast %3 : vector<1x128xf32> to vector<2x128xf32>
    %82 = arith.addf %80, %81 : vector<2x128xf32>
    %83 = arith.negf %82 : vector<2x128xf32>
    %84 = math.exp %83 : vector<2x128xf32>
    %cst_17 = arith.constant 1.000000e+00 : f32
    %85 = vector.broadcast %cst_17 : f32 to vector<2x128xf32>
    %86 = arith.addf %85, %84 : vector<2x128xf32>
    %87 = arith.divf %85, %86 : vector<2x128xf32>
    %88 = math.tanh %82 : vector<2x128xf32>
    %89 = vector.extract_strided_slice %87 {offsets = [0, 0], sizes = [2, 32], strides = [1, 1]} : vector<2x128xf32> to vector<2x32xf32>
    %90 = vector.extract_strided_slice %87 {offsets = [0, 32], sizes = [2, 32], strides = [1, 1]} : vector<2x128xf32> to vector<2x32xf32>
    %91 = vector.extract_strided_slice %88 {offsets = [0, 64], sizes = [2, 32], strides = [1, 1]} : vector<2x128xf32> to vector<2x32xf32>
    %92 = vector.extract_strided_slice %87 {offsets = [0, 96], sizes = [2, 32], strides = [1, 1]} : vector<2x128xf32> to vector<2x32xf32>
    %93 = arith.mulf %90, %49 : vector<2x32xf32>
    %94 = arith.mulf %89, %91 : vector<2x32xf32>
    %95 = arith.addf %93, %94 : vector<2x32xf32>
    %96 = math.tanh %95 : vector<2x32xf32>
    %97 = arith.mulf %92, %96 : vector<2x32xf32>
    %c2_i32 = arith.constant 2 : i32
    %98 = arith.index_cast %c2_i32 : i32 to index
    %c0_18 = arith.constant 0 : index
    %c0_19 = arith.constant 0 : index
    %99 = vector.load %arg0[%98, %c0_18, %c0_19] : memref<8x2x1xf32, #tpu.memory_space<vmem>>, vector<1x2x1xf32>
    %100 = vector.shape_cast %99 : vector<1x2x1xf32> to vector<2x1xf32>
    %101 = vector.broadcast %100 : vector<2x1xf32> to vector<2x128xf32>
    %102 = vector.broadcast %0 : vector<1x128xf32> to vector<2x128xf32>
    %103 = arith.mulf %101, %102 : vector<2x128xf32>
    %104 = vector.broadcast %1 : vector<1x128xf32> to vector<2x128xf32>
    %105 = arith.addf %103, %104 : vector<2x128xf32>
    %106 = arith.addf %105, %79 : vector<2x128xf32>
    %107 = arith.negf %106 : vector<2x128xf32>
    %108 = math.exp %107 : vector<2x128xf32>
    %cst_20 = arith.constant 1.000000e+00 : f32
    %109 = vector.broadcast %cst_20 : f32 to vector<2x128xf32>
    %110 = arith.addf %109, %108 : vector<2x128xf32>
    %111 = arith.divf %109, %110 : vector<2x128xf32>
    %112 = math.tanh %106 : vector<2x128xf32>
    %113 = vector.extract_strided_slice %111 {offsets = [0, 0], sizes = [2, 32], strides = [1, 1]} : vector<2x128xf32> to vector<2x32xf32>
    %114 = vector.extract_strided_slice %111 {offsets = [0, 32], sizes = [2, 32], strides = [1, 1]} : vector<2x128xf32> to vector<2x32xf32>
    %115 = vector.extract_strided_slice %112 {offsets = [0, 64], sizes = [2, 32], strides = [1, 1]} : vector<2x128xf32> to vector<2x32xf32>
    %116 = vector.extract_strided_slice %111 {offsets = [0, 96], sizes = [2, 32], strides = [1, 1]} : vector<2x128xf32> to vector<2x32xf32>
    %117 = arith.mulf %114, %73 : vector<2x32xf32>
    %118 = arith.mulf %113, %115 : vector<2x32xf32>
    %119 = arith.addf %117, %118 : vector<2x32xf32>
    %120 = math.tanh %119 : vector<2x32xf32>
    %121 = arith.mulf %116, %120 : vector<2x32xf32>
    %122 = tpu.concatenate %121, %97 in 1 : vector<2x32xf32>, vector<2x32xf32> -> vector<2x64xf32>
    %123 = arith.truncf %122 : vector<2x64xf32> to vector<2x64xbf16>
    %cst_21 = arith.constant dense<0.000000e+00> : vector<2x256xf32>
    %124 = tpu.matmul %123, %2, %cst_21 {dimension_numbers = #tpu.dot_dimension_numbers<[1], [0], [0], [1], [0, 0, 1, 1], [], []>} : vector<2x64xbf16>, vector<64x256xbf16>, vector<2x256xf32> -> vector<2x256xf32>
    %125 = vector.extract_strided_slice %124 {offsets = [0, 0], sizes = [2, 128], strides = [1, 1]} : vector<2x256xf32> to vector<2x128xf32>
    %126 = vector.extract_strided_slice %124 {offsets = [0, 128], sizes = [2, 128], strides = [1, 1]} : vector<2x256xf32> to vector<2x128xf32>
    %127 = vector.broadcast %3 : vector<1x128xf32> to vector<2x128xf32>
    %128 = arith.addf %126, %127 : vector<2x128xf32>
    %129 = arith.negf %128 : vector<2x128xf32>
    %130 = math.exp %129 : vector<2x128xf32>
    %cst_22 = arith.constant 1.000000e+00 : f32
    %131 = vector.broadcast %cst_22 : f32 to vector<2x128xf32>
    %132 = arith.addf %131, %130 : vector<2x128xf32>
    %133 = arith.divf %131, %132 : vector<2x128xf32>
    %134 = math.tanh %128 : vector<2x128xf32>
    %135 = vector.extract_strided_slice %133 {offsets = [0, 0], sizes = [2, 32], strides = [1, 1]} : vector<2x128xf32> to vector<2x32xf32>
    %136 = vector.extract_strided_slice %133 {offsets = [0, 32], sizes = [2, 32], strides = [1, 1]} : vector<2x128xf32> to vector<2x32xf32>
    %137 = vector.extract_strided_slice %134 {offsets = [0, 64], sizes = [2, 32], strides = [1, 1]} : vector<2x128xf32> to vector<2x32xf32>
    %138 = vector.extract_strided_slice %133 {offsets = [0, 96], sizes = [2, 32], strides = [1, 1]} : vector<2x128xf32> to vector<2x32xf32>
    %139 = arith.mulf %136, %95 : vector<2x32xf32>
    %140 = arith.mulf %135, %137 : vector<2x32xf32>
    %141 = arith.addf %139, %140 : vector<2x32xf32>
    %142 = math.tanh %141 : vector<2x32xf32>
    %143 = arith.mulf %138, %142 : vector<2x32xf32>
    %c3_i32 = arith.constant 3 : i32
    %144 = arith.index_cast %c3_i32 : i32 to index
    %c0_23 = arith.constant 0 : index
    %c0_24 = arith.constant 0 : index
    %145 = vector.load %arg0[%144, %c0_23, %c0_24] : memref<8x2x1xf32, #tpu.memory_space<vmem>>, vector<1x2x1xf32>
    %146 = vector.shape_cast %145 : vector<1x2x1xf32> to vector<2x1xf32>
    %147 = vector.broadcast %146 : vector<2x1xf32> to vector<2x128xf32>
    %148 = vector.broadcast %0 : vector<1x128xf32> to vector<2x128xf32>
    %149 = arith.mulf %147, %148 : vector<2x128xf32>
    %150 = vector.broadcast %1 : vector<1x128xf32> to vector<2x128xf32>
    %151 = arith.addf %149, %150 : vector<2x128xf32>
    %152 = arith.addf %151, %125 : vector<2x128xf32>
    %153 = arith.negf %152 : vector<2x128xf32>
    %154 = math.exp %153 : vector<2x128xf32>
    %cst_25 = arith.constant 1.000000e+00 : f32
    %155 = vector.broadcast %cst_25 : f32 to vector<2x128xf32>
    %156 = arith.addf %155, %154 : vector<2x128xf32>
    %157 = arith.divf %155, %156 : vector<2x128xf32>
    %158 = math.tanh %152 : vector<2x128xf32>
    %159 = vector.extract_strided_slice %157 {offsets = [0, 0], sizes = [2, 32], strides = [1, 1]} : vector<2x128xf32> to vector<2x32xf32>
    %160 = vector.extract_strided_slice %157 {offsets = [0, 32], sizes = [2, 32], strides = [1, 1]} : vector<2x128xf32> to vector<2x32xf32>
    %161 = vector.extract_strided_slice %158 {offsets = [0, 64], sizes = [2, 32], strides = [1, 1]} : vector<2x128xf32> to vector<2x32xf32>
    %162 = vector.extract_strided_slice %157 {offsets = [0, 96], sizes = [2, 32], strides = [1, 1]} : vector<2x128xf32> to vector<2x32xf32>
    %163 = arith.mulf %160, %119 : vector<2x32xf32>
    %164 = arith.mulf %159, %161 : vector<2x32xf32>
    %165 = arith.addf %163, %164 : vector<2x32xf32>
    %166 = math.tanh %165 : vector<2x32xf32>
    %167 = arith.mulf %162, %166 : vector<2x32xf32>
    %168 = tpu.concatenate %167, %143 in 1 : vector<2x32xf32>, vector<2x32xf32> -> vector<2x64xf32>
    %169 = arith.truncf %168 : vector<2x64xf32> to vector<2x64xbf16>
    %cst_26 = arith.constant dense<0.000000e+00> : vector<2x256xf32>
    %170 = tpu.matmul %169, %2, %cst_26 {dimension_numbers = #tpu.dot_dimension_numbers<[1], [0], [0], [1], [0, 0, 1, 1], [], []>} : vector<2x64xbf16>, vector<64x256xbf16>, vector<2x256xf32> -> vector<2x256xf32>
    %171 = vector.extract_strided_slice %170 {offsets = [0, 0], sizes = [2, 128], strides = [1, 1]} : vector<2x256xf32> to vector<2x128xf32>
    %172 = vector.extract_strided_slice %170 {offsets = [0, 128], sizes = [2, 128], strides = [1, 1]} : vector<2x256xf32> to vector<2x128xf32>
    %173 = vector.broadcast %3 : vector<1x128xf32> to vector<2x128xf32>
    %174 = arith.addf %172, %173 : vector<2x128xf32>
    %175 = arith.negf %174 : vector<2x128xf32>
    %176 = math.exp %175 : vector<2x128xf32>
    %cst_27 = arith.constant 1.000000e+00 : f32
    %177 = vector.broadcast %cst_27 : f32 to vector<2x128xf32>
    %178 = arith.addf %177, %176 : vector<2x128xf32>
    %179 = arith.divf %177, %178 : vector<2x128xf32>
    %180 = math.tanh %174 : vector<2x128xf32>
    %181 = vector.extract_strided_slice %179 {offsets = [0, 0], sizes = [2, 32], strides = [1, 1]} : vector<2x128xf32> to vector<2x32xf32>
    %182 = vector.extract_strided_slice %179 {offsets = [0, 32], sizes = [2, 32], strides = [1, 1]} : vector<2x128xf32> to vector<2x32xf32>
    %183 = vector.extract_strided_slice %180 {offsets = [0, 64], sizes = [2, 32], strides = [1, 1]} : vector<2x128xf32> to vector<2x32xf32>
    %184 = vector.extract_strided_slice %179 {offsets = [0, 96], sizes = [2, 32], strides = [1, 1]} : vector<2x128xf32> to vector<2x32xf32>
    %185 = arith.mulf %182, %141 : vector<2x32xf32>
    %186 = arith.mulf %181, %183 : vector<2x32xf32>
    %187 = arith.addf %185, %186 : vector<2x32xf32>
    %188 = math.tanh %187 : vector<2x32xf32>
    %189 = arith.mulf %184, %188 : vector<2x32xf32>
    %c4_i32 = arith.constant 4 : i32
    %190 = arith.index_cast %c4_i32 : i32 to index
    %c0_28 = arith.constant 0 : index
    %c0_29 = arith.constant 0 : index
    %191 = vector.load %arg0[%190, %c0_28, %c0_29] : memref<8x2x1xf32, #tpu.memory_space<vmem>>, vector<1x2x1xf32>
    %192 = vector.shape_cast %191 : vector<1x2x1xf32> to vector<2x1xf32>
    %193 = vector.broadcast %192 : vector<2x1xf32> to vector<2x128xf32>
    %194 = vector.broadcast %0 : vector<1x128xf32> to vector<2x128xf32>
    %195 = arith.mulf %193, %194 : vector<2x128xf32>
    %196 = vector.broadcast %1 : vector<1x128xf32> to vector<2x128xf32>
    %197 = arith.addf %195, %196 : vector<2x128xf32>
    %198 = arith.addf %197, %171 : vector<2x128xf32>
    %199 = arith.negf %198 : vector<2x128xf32>
    %200 = math.exp %199 : vector<2x128xf32>
    %cst_30 = arith.constant 1.000000e+00 : f32
    %201 = vector.broadcast %cst_30 : f32 to vector<2x128xf32>
    %202 = arith.addf %201, %200 : vector<2x128xf32>
    %203 = arith.divf %201, %202 : vector<2x128xf32>
    %204 = math.tanh %198 : vector<2x128xf32>
    %205 = vector.extract_strided_slice %203 {offsets = [0, 0], sizes = [2, 32], strides = [1, 1]} : vector<2x128xf32> to vector<2x32xf32>
    %206 = vector.extract_strided_slice %203 {offsets = [0, 32], sizes = [2, 32], strides = [1, 1]} : vector<2x128xf32> to vector<2x32xf32>
    %207 = vector.extract_strided_slice %204 {offsets = [0, 64], sizes = [2, 32], strides = [1, 1]} : vector<2x128xf32> to vector<2x32xf32>
    %208 = vector.extract_strided_slice %203 {offsets = [0, 96], sizes = [2, 32], strides = [1, 1]} : vector<2x128xf32> to vector<2x32xf32>
    %209 = arith.mulf %206, %165 : vector<2x32xf32>
    %210 = arith.mulf %205, %207 : vector<2x32xf32>
    %211 = arith.addf %209, %210 : vector<2x32xf32>
    %212 = math.tanh %211 : vector<2x32xf32>
    %213 = arith.mulf %208, %212 : vector<2x32xf32>
    %214 = tpu.concatenate %213, %189 in 1 : vector<2x32xf32>, vector<2x32xf32> -> vector<2x64xf32>
    %215 = arith.truncf %214 : vector<2x64xf32> to vector<2x64xbf16>
    %cst_31 = arith.constant dense<0.000000e+00> : vector<2x256xf32>
    %216 = tpu.matmul %215, %2, %cst_31 {dimension_numbers = #tpu.dot_dimension_numbers<[1], [0], [0], [1], [0, 0, 1, 1], [], []>} : vector<2x64xbf16>, vector<64x256xbf16>, vector<2x256xf32> -> vector<2x256xf32>
    %217 = vector.extract_strided_slice %216 {offsets = [0, 0], sizes = [2, 128], strides = [1, 1]} : vector<2x256xf32> to vector<2x128xf32>
    %218 = vector.extract_strided_slice %216 {offsets = [0, 128], sizes = [2, 128], strides = [1, 1]} : vector<2x256xf32> to vector<2x128xf32>
    %219 = vector.broadcast %3 : vector<1x128xf32> to vector<2x128xf32>
    %220 = arith.addf %218, %219 : vector<2x128xf32>
    %221 = arith.negf %220 : vector<2x128xf32>
    %222 = math.exp %221 : vector<2x128xf32>
    %cst_32 = arith.constant 1.000000e+00 : f32
    %223 = vector.broadcast %cst_32 : f32 to vector<2x128xf32>
    %224 = arith.addf %223, %222 : vector<2x128xf32>
    %225 = arith.divf %223, %224 : vector<2x128xf32>
    %226 = math.tanh %220 : vector<2x128xf32>
    %227 = vector.extract_strided_slice %225 {offsets = [0, 0], sizes = [2, 32], strides = [1, 1]} : vector<2x128xf32> to vector<2x32xf32>
    %228 = vector.extract_strided_slice %225 {offsets = [0, 32], sizes = [2, 32], strides = [1, 1]} : vector<2x128xf32> to vector<2x32xf32>
    %229 = vector.extract_strided_slice %226 {offsets = [0, 64], sizes = [2, 32], strides = [1, 1]} : vector<2x128xf32> to vector<2x32xf32>
    %230 = vector.extract_strided_slice %225 {offsets = [0, 96], sizes = [2, 32], strides = [1, 1]} : vector<2x128xf32> to vector<2x32xf32>
    %231 = arith.mulf %228, %187 : vector<2x32xf32>
    %232 = arith.mulf %227, %229 : vector<2x32xf32>
    %233 = arith.addf %231, %232 : vector<2x32xf32>
    %234 = math.tanh %233 : vector<2x32xf32>
    %235 = arith.mulf %230, %234 : vector<2x32xf32>
    %c5_i32 = arith.constant 5 : i32
    %236 = arith.index_cast %c5_i32 : i32 to index
    %c0_33 = arith.constant 0 : index
    %c0_34 = arith.constant 0 : index
    %237 = vector.load %arg0[%236, %c0_33, %c0_34] : memref<8x2x1xf32, #tpu.memory_space<vmem>>, vector<1x2x1xf32>
    %238 = vector.shape_cast %237 : vector<1x2x1xf32> to vector<2x1xf32>
    %239 = vector.broadcast %238 : vector<2x1xf32> to vector<2x128xf32>
    %240 = vector.broadcast %0 : vector<1x128xf32> to vector<2x128xf32>
    %241 = arith.mulf %239, %240 : vector<2x128xf32>
    %242 = vector.broadcast %1 : vector<1x128xf32> to vector<2x128xf32>
    %243 = arith.addf %241, %242 : vector<2x128xf32>
    %244 = arith.addf %243, %217 : vector<2x128xf32>
    %245 = arith.negf %244 : vector<2x128xf32>
    %246 = math.exp %245 : vector<2x128xf32>
    %cst_35 = arith.constant 1.000000e+00 : f32
    %247 = vector.broadcast %cst_35 : f32 to vector<2x128xf32>
    %248 = arith.addf %247, %246 : vector<2x128xf32>
    %249 = arith.divf %247, %248 : vector<2x128xf32>
    %250 = math.tanh %244 : vector<2x128xf32>
    %251 = vector.extract_strided_slice %249 {offsets = [0, 0], sizes = [2, 32], strides = [1, 1]} : vector<2x128xf32> to vector<2x32xf32>
    %252 = vector.extract_strided_slice %249 {offsets = [0, 32], sizes = [2, 32], strides = [1, 1]} : vector<2x128xf32> to vector<2x32xf32>
    %253 = vector.extract_strided_slice %250 {offsets = [0, 64], sizes = [2, 32], strides = [1, 1]} : vector<2x128xf32> to vector<2x32xf32>
    %254 = vector.extract_strided_slice %249 {offsets = [0, 96], sizes = [2, 32], strides = [1, 1]} : vector<2x128xf32> to vector<2x32xf32>
    %255 = arith.mulf %252, %211 : vector<2x32xf32>
    %256 = arith.mulf %251, %253 : vector<2x32xf32>
    %257 = arith.addf %255, %256 : vector<2x32xf32>
    %258 = math.tanh %257 : vector<2x32xf32>
    %259 = arith.mulf %254, %258 : vector<2x32xf32>
    %260 = tpu.concatenate %259, %235 in 1 : vector<2x32xf32>, vector<2x32xf32> -> vector<2x64xf32>
    %261 = arith.truncf %260 : vector<2x64xf32> to vector<2x64xbf16>
    %cst_36 = arith.constant dense<0.000000e+00> : vector<2x256xf32>
    %262 = tpu.matmul %261, %2, %cst_36 {dimension_numbers = #tpu.dot_dimension_numbers<[1], [0], [0], [1], [0, 0, 1, 1], [], []>} : vector<2x64xbf16>, vector<64x256xbf16>, vector<2x256xf32> -> vector<2x256xf32>
    %263 = vector.extract_strided_slice %262 {offsets = [0, 0], sizes = [2, 128], strides = [1, 1]} : vector<2x256xf32> to vector<2x128xf32>
    %264 = vector.extract_strided_slice %262 {offsets = [0, 128], sizes = [2, 128], strides = [1, 1]} : vector<2x256xf32> to vector<2x128xf32>
    %265 = vector.broadcast %3 : vector<1x128xf32> to vector<2x128xf32>
    %266 = arith.addf %264, %265 : vector<2x128xf32>
    %267 = arith.negf %266 : vector<2x128xf32>
    %268 = math.exp %267 : vector<2x128xf32>
    %cst_37 = arith.constant 1.000000e+00 : f32
    %269 = vector.broadcast %cst_37 : f32 to vector<2x128xf32>
    %270 = arith.addf %269, %268 : vector<2x128xf32>
    %271 = arith.divf %269, %270 : vector<2x128xf32>
    %272 = math.tanh %266 : vector<2x128xf32>
    %273 = vector.extract_strided_slice %271 {offsets = [0, 0], sizes = [2, 32], strides = [1, 1]} : vector<2x128xf32> to vector<2x32xf32>
    %274 = vector.extract_strided_slice %271 {offsets = [0, 32], sizes = [2, 32], strides = [1, 1]} : vector<2x128xf32> to vector<2x32xf32>
    %275 = vector.extract_strided_slice %272 {offsets = [0, 64], sizes = [2, 32], strides = [1, 1]} : vector<2x128xf32> to vector<2x32xf32>
    %276 = vector.extract_strided_slice %271 {offsets = [0, 96], sizes = [2, 32], strides = [1, 1]} : vector<2x128xf32> to vector<2x32xf32>
    %277 = arith.mulf %274, %233 : vector<2x32xf32>
    %278 = arith.mulf %273, %275 : vector<2x32xf32>
    %279 = arith.addf %277, %278 : vector<2x32xf32>
    %280 = math.tanh %279 : vector<2x32xf32>
    %281 = arith.mulf %276, %280 : vector<2x32xf32>
    %c6_i32 = arith.constant 6 : i32
    %282 = arith.index_cast %c6_i32 : i32 to index
    %c0_38 = arith.constant 0 : index
    %c0_39 = arith.constant 0 : index
    %283 = vector.load %arg0[%282, %c0_38, %c0_39] : memref<8x2x1xf32, #tpu.memory_space<vmem>>, vector<1x2x1xf32>
    %284 = vector.shape_cast %283 : vector<1x2x1xf32> to vector<2x1xf32>
    %285 = vector.broadcast %284 : vector<2x1xf32> to vector<2x128xf32>
    %286 = vector.broadcast %0 : vector<1x128xf32> to vector<2x128xf32>
    %287 = arith.mulf %285, %286 : vector<2x128xf32>
    %288 = vector.broadcast %1 : vector<1x128xf32> to vector<2x128xf32>
    %289 = arith.addf %287, %288 : vector<2x128xf32>
    %290 = arith.addf %289, %263 : vector<2x128xf32>
    %291 = arith.negf %290 : vector<2x128xf32>
    %292 = math.exp %291 : vector<2x128xf32>
    %cst_40 = arith.constant 1.000000e+00 : f32
    %293 = vector.broadcast %cst_40 : f32 to vector<2x128xf32>
    %294 = arith.addf %293, %292 : vector<2x128xf32>
    %295 = arith.divf %293, %294 : vector<2x128xf32>
    %296 = math.tanh %290 : vector<2x128xf32>
    %297 = vector.extract_strided_slice %295 {offsets = [0, 0], sizes = [2, 32], strides = [1, 1]} : vector<2x128xf32> to vector<2x32xf32>
    %298 = vector.extract_strided_slice %295 {offsets = [0, 32], sizes = [2, 32], strides = [1, 1]} : vector<2x128xf32> to vector<2x32xf32>
    %299 = vector.extract_strided_slice %296 {offsets = [0, 64], sizes = [2, 32], strides = [1, 1]} : vector<2x128xf32> to vector<2x32xf32>
    %300 = vector.extract_strided_slice %295 {offsets = [0, 96], sizes = [2, 32], strides = [1, 1]} : vector<2x128xf32> to vector<2x32xf32>
    %301 = arith.mulf %298, %257 : vector<2x32xf32>
    %302 = arith.mulf %297, %299 : vector<2x32xf32>
    %303 = arith.addf %301, %302 : vector<2x32xf32>
    %304 = math.tanh %303 : vector<2x32xf32>
    %305 = arith.mulf %300, %304 : vector<2x32xf32>
    %306 = tpu.concatenate %305, %281 in 1 : vector<2x32xf32>, vector<2x32xf32> -> vector<2x64xf32>
    %307 = arith.truncf %306 : vector<2x64xf32> to vector<2x64xbf16>
    %cst_41 = arith.constant dense<0.000000e+00> : vector<2x256xf32>
    %308 = tpu.matmul %307, %2, %cst_41 {dimension_numbers = #tpu.dot_dimension_numbers<[1], [0], [0], [1], [0, 0, 1, 1], [], []>} : vector<2x64xbf16>, vector<64x256xbf16>, vector<2x256xf32> -> vector<2x256xf32>
    %309 = vector.extract_strided_slice %308 {offsets = [0, 0], sizes = [2, 128], strides = [1, 1]} : vector<2x256xf32> to vector<2x128xf32>
    %310 = vector.extract_strided_slice %308 {offsets = [0, 128], sizes = [2, 128], strides = [1, 1]} : vector<2x256xf32> to vector<2x128xf32>
    %311 = vector.broadcast %3 : vector<1x128xf32> to vector<2x128xf32>
    %312 = arith.addf %310, %311 : vector<2x128xf32>
    %313 = arith.negf %312 : vector<2x128xf32>
    %314 = math.exp %313 : vector<2x128xf32>
    %cst_42 = arith.constant 1.000000e+00 : f32
    %315 = vector.broadcast %cst_42 : f32 to vector<2x128xf32>
    %316 = arith.addf %315, %314 : vector<2x128xf32>
    %317 = arith.divf %315, %316 : vector<2x128xf32>
    %318 = math.tanh %312 : vector<2x128xf32>
    %319 = vector.extract_strided_slice %317 {offsets = [0, 0], sizes = [2, 32], strides = [1, 1]} : vector<2x128xf32> to vector<2x32xf32>
    %320 = vector.extract_strided_slice %317 {offsets = [0, 32], sizes = [2, 32], strides = [1, 1]} : vector<2x128xf32> to vector<2x32xf32>
    %321 = vector.extract_strided_slice %318 {offsets = [0, 64], sizes = [2, 32], strides = [1, 1]} : vector<2x128xf32> to vector<2x32xf32>
    %322 = vector.extract_strided_slice %317 {offsets = [0, 96], sizes = [2, 32], strides = [1, 1]} : vector<2x128xf32> to vector<2x32xf32>
    %323 = arith.mulf %320, %279 : vector<2x32xf32>
    %324 = arith.mulf %319, %321 : vector<2x32xf32>
    %325 = arith.addf %323, %324 : vector<2x32xf32>
    %326 = math.tanh %325 : vector<2x32xf32>
    %327 = arith.mulf %322, %326 : vector<2x32xf32>
    %c7_i32 = arith.constant 7 : i32
    %328 = arith.index_cast %c7_i32 : i32 to index
    %c0_43 = arith.constant 0 : index
    %c0_44 = arith.constant 0 : index
    %329 = vector.load %arg0[%328, %c0_43, %c0_44] : memref<8x2x1xf32, #tpu.memory_space<vmem>>, vector<1x2x1xf32>
    %330 = vector.shape_cast %329 : vector<1x2x1xf32> to vector<2x1xf32>
    %331 = vector.broadcast %330 : vector<2x1xf32> to vector<2x128xf32>
    %332 = vector.broadcast %0 : vector<1x128xf32> to vector<2x128xf32>
    %333 = arith.mulf %331, %332 : vector<2x128xf32>
    %334 = vector.broadcast %1 : vector<1x128xf32> to vector<2x128xf32>
    %335 = arith.addf %333, %334 : vector<2x128xf32>
    %336 = arith.addf %335, %309 : vector<2x128xf32>
    %337 = arith.negf %336 : vector<2x128xf32>
    %338 = math.exp %337 : vector<2x128xf32>
    %cst_45 = arith.constant 1.000000e+00 : f32
    %339 = vector.broadcast %cst_45 : f32 to vector<2x128xf32>
    %340 = arith.addf %339, %338 : vector<2x128xf32>
    %341 = arith.divf %339, %340 : vector<2x128xf32>
    %342 = math.tanh %336 : vector<2x128xf32>
    %343 = vector.extract_strided_slice %341 {offsets = [0, 0], sizes = [2, 32], strides = [1, 1]} : vector<2x128xf32> to vector<2x32xf32>
    %344 = vector.extract_strided_slice %341 {offsets = [0, 32], sizes = [2, 32], strides = [1, 1]} : vector<2x128xf32> to vector<2x32xf32>
    %345 = vector.extract_strided_slice %342 {offsets = [0, 64], sizes = [2, 32], strides = [1, 1]} : vector<2x128xf32> to vector<2x32xf32>
    %346 = vector.extract_strided_slice %341 {offsets = [0, 96], sizes = [2, 32], strides = [1, 1]} : vector<2x128xf32> to vector<2x32xf32>
    %347 = arith.mulf %344, %303 : vector<2x32xf32>
    %348 = arith.mulf %343, %345 : vector<2x32xf32>
    %349 = arith.addf %347, %348 : vector<2x32xf32>
    %350 = math.tanh %349 : vector<2x32xf32>
    %351 = arith.mulf %346, %350 : vector<2x32xf32>
    %352 = tpu.concatenate %351, %327 in 1 : vector<2x32xf32>, vector<2x32xf32> -> vector<2x64xf32>
    %353 = arith.truncf %352 : vector<2x64xf32> to vector<2x64xbf16>
    %cst_46 = arith.constant dense<0.000000e+00> : vector<2x256xf32>
    %354 = tpu.matmul %353, %2, %cst_46 {dimension_numbers = #tpu.dot_dimension_numbers<[1], [0], [0], [1], [0, 0, 1, 1], [], []>} : vector<2x64xbf16>, vector<64x256xbf16>, vector<2x256xf32> -> vector<2x256xf32>
    %355 = vector.extract_strided_slice %354 {offsets = [0, 0], sizes = [2, 128], strides = [1, 1]} : vector<2x256xf32> to vector<2x128xf32>
    %356 = vector.extract_strided_slice %354 {offsets = [0, 128], sizes = [2, 128], strides = [1, 1]} : vector<2x256xf32> to vector<2x128xf32>
    %357 = vector.broadcast %3 : vector<1x128xf32> to vector<2x128xf32>
    %358 = arith.addf %356, %357 : vector<2x128xf32>
    %359 = arith.negf %358 : vector<2x128xf32>
    %360 = math.exp %359 : vector<2x128xf32>
    %cst_47 = arith.constant 1.000000e+00 : f32
    %361 = vector.broadcast %cst_47 : f32 to vector<2x128xf32>
    %362 = arith.addf %361, %360 : vector<2x128xf32>
    %363 = arith.divf %361, %362 : vector<2x128xf32>
    %364 = math.tanh %358 : vector<2x128xf32>
    %365 = vector.extract_strided_slice %363 {offsets = [0, 0], sizes = [2, 32], strides = [1, 1]} : vector<2x128xf32> to vector<2x32xf32>
    %366 = vector.extract_strided_slice %363 {offsets = [0, 32], sizes = [2, 32], strides = [1, 1]} : vector<2x128xf32> to vector<2x32xf32>
    %367 = vector.extract_strided_slice %364 {offsets = [0, 64], sizes = [2, 32], strides = [1, 1]} : vector<2x128xf32> to vector<2x32xf32>
    %368 = vector.extract_strided_slice %363 {offsets = [0, 96], sizes = [2, 32], strides = [1, 1]} : vector<2x128xf32> to vector<2x32xf32>
    %369 = arith.mulf %366, %325 : vector<2x32xf32>
    %370 = arith.mulf %365, %367 : vector<2x32xf32>
    %371 = arith.addf %369, %370 : vector<2x32xf32>
    %372 = math.tanh %371 : vector<2x32xf32>
    %373 = arith.mulf %368, %372 : vector<2x32xf32>
    %c8_i32 = arith.constant 8 : i32
    %c0_48 = arith.constant 0 : index
    %c0_49 = arith.constant 0 : index
    %374 = vector.load %arg5[%c0_48, %c0_49] : memref<2x32xf32, #tpu.memory_space<vmem>>, vector<2x32xf32>
    tpu.vector_store %arg5[%c0_48, %c0_49], %373 {strides = array<i32>} : memref<2x32xf32, #tpu.memory_space<vmem>>, vector<2x32xf32>,
    return
  }
}

</mosaic_0001>

<bundles_post_ra>
// kernel: lstm_forward.1
= control target key start
LH: loop header
LB: loop body
LE: loop exit
PB: predicated region body
PF: predicated region fallthrough
CT: control target
= control target key end

     0   :  { %10 = vsyncpa [#allocation3], 0  ;;  %s1227_s18 = smov [#allocation2]   ;;  %s1546_s0 = inlined_call_operand.vmem [shape: f32[8,2,1], index: 0, kind: input, shape index: {}]   ;;  %s1547_s1 = inlined_call_operand.vmem [shape: f32[1,128], index: 1, kind: input, shape index: {}]   ;;  %s1548_s2 = inlined_call_operand.vmem [shape: f32[1,128], index: 2, kind: input, shape index: {}]   ;;  %s1549_s3 = inlined_call_operand.hbm [shape: bf16[64,256], index: 3, kind: input, shape index: {}]   ;;  %s1550_s4 = inlined_call_operand.vmem [shape: f32[1,128], index: 4, kind: input, shape index: {}]   ;;  %s1551_s5 = inlined_call_operand.vmem [shape: f32[2,32], index: 5, kind: output, shape index: {}]  }
   0x1   :  { %s22_s19 = sshll.u32 %s1227_s18, 4  ;;  %s23_s19 = int_to_ptr.vmem [resolvable:$true] %s22_s19 }
   0x2   :  { %s1213_s20 = scalar_lea.vmem %s23_s19, 1024  ;;  %p1218_p1 = scmp.lt.s32.totalorder %s23_s19, %s23_s19 }
   0x3   :  { %p1214_p0 = scmp.ne.s32.totalorder %s23_s19, %s1213_s20  ;;  %p1219_p2 = scmp.lt.s32.totalorder %s1213_s20, %s1213_s20 }
   0x5   :  { %p1220_p3 = por %p1219_p2, %p1218_p1 }
   0x7   :  { %p1221_p4 = pnand %p1220_p3, %p1214_p0 }
   0x9   :  { %1224 = shalt.err (!%p1221_p4)
}
   0xa   :  { %s1228_s21 = smov 128   ;;  %s1229_s22 = smov 8  }
   0xb   :  { %28 = dma.hbm_to_vmem [thread:$0]  %s1549_s3, 1024, %s23_s19, [#allocation3], %s1228_s21, %s1228_s21, %s1229_s22  }
   0xc   :  { %1225 = dma.done.wait [#allocation3], 1024  }
   0xd   :  { %1226 = vsyncadd [#allocation3], 4294966272  ;;  %v1230_v0 = vmov 0   ;;  %v46_v1 = vld [vmem:[%s1546_s0] sm:$0x3]  ;;  %s1231_s30 = smov 64  }
   0xe   :  { %1063 = vset.pattern.permute.xlu0 %v1230_v0  ;;  %174 = vmatprep.mubr.bf16.mxu0 %v1230_v0  ;;  %v1276_v2 = vld [vmem:[%s1547_s1] ss:$0 sm:$0xff]  ;;  %s1232_s1 = smov 32   ;;  %v1290_v17 = vld [vmem:[#allocation2 + $0x34] ss:$8 sps:$4 sm:$0xff]   ;;  %vm95_vm0 = vcmask 261120  }
   0xf   :  { %1064 = vset.pattern.permute.xlu1 %v1230_v0  ;;  %293 = vmatprep.mubr.bf16.mxu1 %v1230_v0  ;;  %v1281_v4 = vld [vmem:[%s1548_s2] ss:$0 sm:$0xff]  ;;  %v1292_v18 = vld [vmem:[#allocation2 + $0x30] ss:$8 sps:$4 sm:$0xff]   ;;  %v1294_v19 = vld [vmem:[#allocation2 + $0x24] ss:$8 sps:$4 sm:$0xff]  }
  0x10   :  { %49 = vperm.xlu0 %1063, %v46_v1   ;;  %150 = vmatprep.subr.bf16.mxu0 %v1290_v17  ;;  %v1299_v20 = vld [vmem:[#allocation2 + $0x20] ss:$8 sps:$4 sm:$0xff]   ;;  %v1303_v21 = vld [vmem:[#allocation2 + $0x14] ss:$8 sps:$4 sm:$0xff]   ;;  %v1307_v22 = vld [vmem:[#allocation2 + $0x10] ss:$8 sps:$4 sm:$0xff]  }
  0x11   :  { %269 = vmatprep.subr.bf16.mxu1 %v1290_v17  ;;  %151 = vmatpush1.bf16.msra.mxu0 %v1292_v18  ;;  %v1311_v23 = vld [vmem:[#allocation2 + $0x4] ss:$8 sps:$4 sm:$0xff]   ;;  %v1319_v25 = vld [vmem:[#allocation2] ss:$8 sps:$4 sm:$0xff]   ;;  %vm138_vm1 = vcmask 523264   ;;  %vm1008_vm2 = vcmask 254976  }
  0x12   :  { %270 = vmatpush1.bf16.msra.mxu1 %v1292_v18  ;;  %152 = vmatprep.subr.bf16.mxu0 %v1294_v19  ;;  %v1029_v26 = vld [vmem:[%s1546_s0 + $0x2] sm:$0x3]  ;;  %v1345_v36 = vld [vmem:[%s1550_s4] ss:$0 sm:$0xff] }
  0x13   :  { %271 = vmatprep.subr.bf16.mxu1 %v1294_v19 }
  0x15   :  { %153 = vmatpush1.bf16.msra.mxu0 %v1299_v20 }
  0x16   :  { %272 = vmatpush1.bf16.msra.mxu1 %v1299_v20  ;;  %154 = vmatprep.subr.bf16.mxu0 %v1303_v21 }
  0x17   :  { %273 = vmatprep.subr.bf16.mxu1 %v1303_v21 }
  0x19   :  { %155 = vmatpush1.bf16.msra.mxu0 %v1307_v22 }
  0x1a   :  { %156 = vmatprep.subr.bf16.mxu0 %v1311_v23  ;;  %274 = vmatpush1.bf16.msra.mxu1 %v1307_v22 }
  0x1b   :  { %275 = vmatprep.subr.bf16.mxu1 %v1311_v23 }
  0x1d   :  { %157 = vmatpush1.bf16.msra.mxu0 %v1319_v25 }
  0x1e   :  { %276 = vmatpush1.bf16.msra.mxu1 %v1319_v25  ;;  %382 = vmatprep.subr.bf16.mxu0 %v1290_v17 }
  0x1f   :  { %495 = vmatprep.subr.bf16.mxu1 %v1290_v17 }
  0x8b   :  { %v50_v3 = vpop.permute.xlu0 %49 }
  0x8c   :  { %v58_v5 = vmul.f32 %v1276_v2, %v50_v3 }
  0x8e   :  { %v65_v6 = vadd.f32 %v1281_v4, %v58_v5 }
  0x90   :  { %1077 = vtanh.f32 %v65_v6  ;;  %v1017_v8 = vmul.f32 -1.442695, %v65_v6 }
  0x92   :  { %1079 = vpow2.f32 %v1017_v8 }
  0x9d   :  { %v1078_v7 = vpop.eup %1077 }
  0x9e   :  { %76 = vrot.lane.b32.xlu0 %v1078_v7, %s1231_s30  ;;  %v1033_v7 = vld [vmem:[%s1546_s0 + $0x4] sm:$0x3] }
  0x9f   :  { %v1080_v9 = vpop.eup %1079 }
  0xa0   :  { %v70_v10 = vadd.f32 1.0, %v1080_v9 }
  0xa2   :  { %1081 = vrcp.f32 %v70_v10 }
  0xaf   :  { %v1082_v11 = vpop.eup %1081 }
  0xb0   :  { %v74_v14 = vmul.f32 0.0, %v1082_v11 }
 0x110   :  { %v77_v12 = vpop.permute.xlu0 %76 }
 0x111   :  { %v79_v13 = vmul.f32 %v1082_v11, %v77_v12 }
 0x113   :  { %81 = vrot.lane.b32.xlu1 %v79_v13, %s1232_s1 }
 0x185   :  { %v82_v15 = vpop.permute.xlu1 %81 }
 0x186   :  { %v1287_v16 = vadd.f32 %v82_v15, %v74_v14 }
 0x188   :  { %1083 = vtanh.f32 %v1287_v16 }
 0x195   :  { %v1084_v24 = vpop.eup %1083 }
 0x196   :  { %87 = vrot.lane.b32.xlu1 %v1084_v24, %s1231_s30 }
 0x19a   :  { %218 = vperm.xlu1 %1064, %v1029_v26  }
 0x208   :  { %v88_v27 = vpop.permute.xlu1 %87 }
 0x209   :  { %v90_v28 = vmul.f32 %v1082_v11, %v88_v27 }
 0x20b   :  { %92 = vrot.lane.b32.xlu0 %v90_v28, %s1232_s1 }
 0x215   :  { %v219_v32 = vpop.permute.xlu1 %218 }
 0x216   :  { %v221_v33 = vmul.f32 %v1276_v2, %v219_v32 }
 0x218   :  { %v222_v34 = vadd.f32 %v1281_v4, %v221_v33 }
 0x27d   :  { %v93_v29 = vpop.permute.xlu0 %92 }
 0x27e   :  { %v96_v30 = vsel %vm95_vm0, %v93_v29, 0.0 }
 0x27f   :  { %v97_v31 = vpack.c.bf16 %v96_v30, %v96_v30 }
 0x281   :  { %1026 = vmatmul.mubr.msk.bf16.vlgmr.msra.gmra.mxu0 %vm138_vm1, %v97_v31 }
 0x282   :  { %383 = vmatpush1.bf16.msra.mxu0 %v1292_v18  ;;  %406 = vmatprep.mubr.bf16.mxu0 %v1230_v0 }
 0x283   :  { %384 = vmatprep.subr.bf16.mxu0 %v1294_v19 }
 0x286   :  { %385 = vmatpush1.bf16.msra.mxu0 %v1299_v20 }
 0x287   :  { %386 = vmatprep.subr.bf16.mxu0 %v1303_v21 }
 0x28a   :  { %387 = vmatpush1.bf16.msra.mxu0 %v1307_v22 }
 0x28b   :  { %388 = vmatprep.subr.bf16.mxu0 %v1311_v23 }
 0x28e   :  { %389 = vmatpush1.bf16.msra.mxu0 %v1319_v25 }
 0x28f   :  { %608 = vmatprep.subr.bf16.mxu0 %v1290_v17 }
 0x341   :  { %v176_v35 = vpop.f32.mrf.mxu0 }
 0x342   :  { %v223_v37 = vadd.f32 %v222_v34, %v176_v35 }
 0x343   :  { %v178_v38 = vpop.f32.mrf.mxu0 }
 0x344   :  { %1085 = vtanh.f32 %v223_v37  ;;  %v189_v39 = vadd.f32 %v1345_v36, %v178_v38  ;;  %v1030_v44 = vmul.f32 -1.442695, %v223_v37 }
 0x345   :  { %v180_v40 = vpop.f32.mrf.mxu0 }
 0x346   :  { %1087 = vtanh.f32 %v189_v39  ;;  %v1028_v45 = vmul.f32 -1.442695, %v189_v39 }
 0x347   :  { %v181_v41 = vpop.f32.mrf.mxu0  ;;  %1089 = vpow2.f32 %v1030_v44 }
 0x348   :  { %1091 = vpow2.f32 %v1028_v45 }
 0x351   :  { %v1086_v42 = vpop.eup %1085 }
 0x352   :  { %233 = vrot.lane.b32.xlu1 %v1086_v42, %s1231_s30 }
 0x353   :  { %v1088_v43 = vpop.eup %1087 }
 0x354   :  { %199 = vrot.lane.b32.xlu0 %v1088_v43, %s1231_s30  ;;  %v1090_v46 = vpop.eup %1089 }
 0x355   :  { %v1092_v47 = vpop.eup %1091  ;;  %v227_v48 = vadd.f32 1.0, %v1090_v46 }
 0x356   :  { %v193_v49 = vadd.f32 1.0, %v1092_v47 }
 0x357   :  { %1093 = vrcp.f32 %v227_v48 }
 0x358   :  { %1095 = vrcp.f32 %v193_v49 }
 0x364   :  { %v1094_v50 = vpop.eup %1093 }
 0x365   :  { %v1096_v53 = vpop.eup %1095  ;;  %v231_v56 = vmul.f32 %v1094_v50, %v1287_v16 }
 0x366   :  { %v197_v59 = vmul.f32 0.0, %v1096_v53 }
 0x3c4   :  { %v234_v51 = vpop.permute.xlu1 %233 }
 0x3c5   :  { %v236_v52 = vmul.f32 %v1094_v50, %v234_v51 }
 0x3c6   :  { %v200_v54 = vpop.permute.xlu0 %199 }
 0x3c7   :  { %238 = vrot.lane.b32.xlu1 %v236_v52, %s1232_s1  ;;  %v202_v55 = vmul.f32 %v1096_v53, %v200_v54 }
 0x3c9   :  { %204 = vrot.lane.b32.xlu0 %v202_v55, %s1232_s1 }
 0x439   :  { %v239_v57 = vpop.permute.xlu1 %238 }
 0x43a   :  { %v1353_v58 = vadd.f32 %v239_v57, %v231_v56  ;;  %v1037_v56 = vld [vmem:[%s1546_s0 + $0x6] sm:$0x3] }
 0x43b   :  { %v205_v60 = vpop.permute.xlu0 %204 }
 0x43c   :  { %1097 = vtanh.f32 %v1353_v58  ;;  %v1356_v61 = vadd.f32 %v205_v60, %v197_v59 }
 0x43e   :  { %1099 = vtanh.f32 %v1356_v61 }
 0x449   :  { %v1098_v62 = vpop.eup %1097 }
 0x44a   :  { %244 = vrot.lane.b32.xlu1 %v1098_v62, %s1231_s30 }
 0x44b   :  { %v1100_v63 = vpop.eup %1099 }
 0x44c   :  { %210 = vrot.lane.b32.xlu0 %v1100_v63, %s1231_s30 }
 0x4bc   :  { %v245_v1 = vpop.permute.xlu1 %244 }
 0x4bd   :  { %v247_v3 = vmul.f32 %v1094_v50, %v245_v1 }
 0x4be   :  { %v211_v5 = vpop.permute.xlu0 %210 }
 0x4bf   :  { %249 = vrot.lane.b32.xlu0 %v247_v3, %s1232_s1  ;;  %v213_v6 = vmul.f32 %v1096_v53, %v211_v5 }
 0x4c1   :  { %253 = vrot.lane.b32.xlu1 %v213_v6, %s1231_s30 }
 0x4c3   :  { %331 = vperm.xlu0 %1063, %v1033_v7  }
 0x531   :  { %v250_v8 = vpop.permute.xlu0 %249 }
 0x533   :  { %v254_v9 = vpop.permute.xlu1 %253 }
 0x534   :  { %v256_v10 = vsel %vm95_vm0, %v250_v8, %v254_v9 }
 0x535   :  { %v257_v11 = vpack.c.bf16 %v256_v10, %v256_v10 }
 0x537   :  { %1031 = vmatmul.mubr.msk.bf16.vlgmr.msra.gmra.mxu1 %vm138_vm1, %v257_v11 }
 0x538   :  { %496 = vmatpush1.bf16.msra.mxu1 %v1292_v18  ;;  %519 = vmatprep.mubr.bf16.mxu1 %v1230_v0 }
 0x539   :  { %497 = vmatprep.subr.bf16.mxu1 %v1294_v19 }
 0x53c   :  { %498 = vmatpush1.bf16.msra.mxu1 %v1299_v20 }
 0x53d   :  { %499 = vmatprep.subr.bf16.mxu1 %v1303_v21 }
 0x53e   :  { %v332_v12 = vpop.permute.xlu0 %331 }
 0x53f   :  { %v334_v13 = vmul.f32 %v1276_v2, %v332_v12 }
 0x540   :  { %500 = vmatpush1.bf16.msra.mxu1 %v1307_v22 }
 0x541   :  { %501 = vmatprep.subr.bf16.mxu1 %v1311_v23  ;;  %v335_v14 = vadd.f32 %v1281_v4, %v334_v13 }
 0x544   :  { %502 = vmatpush1.bf16.msra.mxu1 %v1319_v25 }
 0x545   :  { %721 = vmatprep.subr.bf16.mxu1 %v1290_v17 }
 0x5f7   :  { %v295_v15 = vpop.f32.mrf.mxu1 }
 0x5f8   :  { %v336_v16 = vadd.f32 %v335_v14, %v295_v15 }
 0x5f9   :  { %v297_v24 = vpop.f32.mrf.mxu1 }
 0x5fa   :  { %1101 = vtanh.f32 %v336_v16  ;;  %v302_v26 = vadd.f32 %v1345_v36, %v297_v24  ;;  %v1034_v31 = vmul.f32 -1.442695, %v336_v16 }
 0x5fb   :  { %v299_v27 = vpop.f32.mrf.mxu1 }
 0x5fc   :  { %1103 = vtanh.f32 %v302_v26  ;;  %v1032_v32 = vmul.f32 -1.442695, %v302_v26 }
 0x5fd   :  { %v300_v28 = vpop.f32.mrf.mxu1  ;;  %1105 = vpow2.f32 %v1034_v31 }
 0x5fe   :  { %1107 = vpow2.f32 %v1032_v32 }
 0x607   :  { %v1102_v29 = vpop.eup %1101 }
 0x608   :  { %346 = vrot.lane.b32.xlu0 %v1102_v29, %s1231_s30 }
 0x609   :  { %v1104_v30 = vpop.eup %1103 }
 0x60a   :  { %312 = vrot.lane.b32.xlu1 %v1104_v30, %s1231_s30  ;;  %v1106_v33 = vpop.eup %1105 }
 0x60b   :  { %v1108_v34 = vpop.eup %1107  ;;  %v340_v35 = vadd.f32 1.0, %v1106_v33 }
 0x60c   :  { %v306_v37 = vadd.f32 1.0, %v1108_v34 }
 0x60d   :  { %1109 = vrcp.f32 %v340_v35 }
 0x60e   :  { %1111 = vrcp.f32 %v306_v37 }
 0x61a   :  { %v1110_v38 = vpop.eup %1109 }
 0x61b   :  { %v1112_v41 = vpop.eup %1111  ;;  %v344_v44 = vmul.f32 %v1110_v38, %v1353_v58 }
 0x61c   :  { %v310_v47 = vmul.f32 %v1112_v41, %v1356_v61 }
 0x67a   :  { %v347_v39 = vpop.permute.xlu0 %346 }
 0x67b   :  { %v349_v40 = vmul.f32 %v1110_v38, %v347_v39 }
 0x67c   :  { %v313_v42 = vpop.permute.xlu1 %312 }
 0x67d   :  { %351 = vrot.lane.b32.xlu0 %v349_v40, %s1232_s1  ;;  %v315_v43 = vmul.f32 %v1112_v41, %v313_v42 }
 0x67f   :  { %317 = vrot.lane.b32.xlu1 %v315_v43, %s1232_s1 }
 0x6ef   :  { %v352_v45 = vpop.permute.xlu0 %351 }
 0x6f0   :  { %v1385_v46 = vadd.f32 %v352_v45, %v344_v44  ;;  %v1041_v44 = vld [vmem:[%s1546_s0 + $0x8] sm:$0x3] }
 0x6f1   :  { %v318_v48 = vpop.permute.xlu1 %317 }
 0x6f2   :  { %1113 = vtanh.f32 %v1385_v46  ;;  %v1389_v49 = vadd.f32 %v318_v48, %v310_v47 }
 0x6f4   :  { %1115 = vtanh.f32 %v1389_v49 }
 0x6ff   :  { %v1114_v50 = vpop.eup %1113 }
 0x700   :  { %357 = vrot.lane.b32.xlu0 %v1114_v50, %s1231_s30 }
 0x701   :  { %v1116_v51 = vpop.eup %1115 }
 0x702   :  { %323 = vrot.lane.b32.xlu1 %v1116_v51, %s1231_s30 }
 0x772   :  { %v358_v52 = vpop.permute.xlu0 %357 }
 0x773   :  { %v360_v53 = vmul.f32 %v1110_v38, %v358_v52 }
 0x774   :  { %v324_v54 = vpop.permute.xlu1 %323 }
 0x775   :  { %362 = vrot.lane.b32.xlu1 %v360_v53, %s1232_s1  ;;  %v326_v55 = vmul.f32 %v1112_v41, %v324_v54 }
 0x777   :  { %366 = vrot.lane.b32.xlu0 %v326_v55, %s1231_s30 }
 0x779   :  { %444 = vperm.xlu1 %1064, %v1037_v56  }
 0x7e7   :  { %v363_v57 = vpop.permute.xlu1 %362 }
 0x7e9   :  { %v367_v58 = vpop.permute.xlu0 %366 }
 0x7ea   :  { %v369_v59 = vsel %vm95_vm0, %v363_v57, %v367_v58 }
 0x7eb   :  { %v370_v60 = vpack.c.bf16 %v369_v59, %v369_v59 }
 0x7ed   :  { %1035 = vmatmul.mubr.msk.bf16.vlgmr.msra.gmra.mxu0 %vm138_vm1, %v370_v60 }
 0x7ee   :  { %609 = vmatpush1.bf16.msra.mxu0 %v1292_v18  ;;  %632 = vmatprep.mubr.bf16.mxu0 %v1230_v0 }
 0x7ef   :  { %610 = vmatprep.subr.bf16.mxu0 %v1294_v19 }
 0x7f2   :  { %611 = vmatpush1.bf16.msra.mxu0 %v1299_v20 }
 0x7f3   :  { %612 = vmatprep.subr.bf16.mxu0 %v1303_v21 }
 0x7f4   :  { %v445_v61 = vpop.permute.xlu1 %444 }
 0x7f5   :  { %v447_v62 = vmul.f32 %v1276_v2, %v445_v61 }
 0x7f6   :  { %613 = vmatpush1.bf16.msra.mxu0 %v1307_v22 }
 0x7f7   :  { %614 = vmatprep.subr.bf16.mxu0 %v1311_v23  ;;  %v448_v63 = vadd.f32 %v1281_v4, %v447_v62 }
 0x7fa   :  { %615 = vmatpush1.bf16.msra.mxu0 %v1319_v25 }
 0x7fb   :  { %834 = vmatprep.subr.bf16.mxu0 %v1290_v17 }
 0x8ad   :  { %v408_v1 = vpop.f32.mrf.mxu0 }
 0x8ae   :  { %v449_v3 = vadd.f32 %v448_v63, %v408_v1 }
 0x8af   :  { %v410_v5 = vpop.f32.mrf.mxu0 }
 0x8b0   :  { %1117 = vtanh.f32 %v449_v3  ;;  %v415_v6 = vadd.f32 %v1345_v36, %v410_v5  ;;  %v1038_v11 = vmul.f32 -1.442695, %v449_v3 }
 0x8b1   :  { %v412_v7 = vpop.f32.mrf.mxu0 }
 0x8b2   :  { %1119 = vtanh.f32 %v415_v6  ;;  %v1036_v12 = vmul.f32 -1.442695, %v415_v6 }
 0x8b3   :  { %v413_v8 = vpop.f32.mrf.mxu0  ;;  %1121 = vpow2.f32 %v1038_v11 }
 0x8b4   :  { %1123 = vpow2.f32 %v1036_v12 }
 0x8bd   :  { %v1118_v9 = vpop.eup %1117 }
 0x8be   :  { %459 = vrot.lane.b32.xlu1 %v1118_v9, %s1231_s30 }
 0x8bf   :  { %v1120_v10 = vpop.eup %1119 }
 0x8c0   :  { %425 = vrot.lane.b32.xlu0 %v1120_v10, %s1231_s30  ;;  %v1122_v13 = vpop.eup %1121 }
 0x8c1   :  { %v1124_v14 = vpop.eup %1123  ;;  %v453_v15 = vadd.f32 1.0, %v1122_v13 }
 0x8c2   :  { %v419_v16 = vadd.f32 1.0, %v1124_v14 }
 0x8c3   :  { %1125 = vrcp.f32 %v453_v15 }
 0x8c4   :  { %1127 = vrcp.f32 %v419_v16 }
 0x8d0   :  { %v1126_v24 = vpop.eup %1125 }
 0x8d1   :  { %v1128_v28 = vpop.eup %1127  ;;  %v457_v31 = vmul.f32 %v1126_v24, %v1385_v46 }
 0x8d2   :  { %v423_v34 = vmul.f32 %v1128_v28, %v1389_v49 }
 0x930   :  { %v460_v26 = vpop.permute.xlu1 %459 }
 0x931   :  { %v462_v27 = vmul.f32 %v1126_v24, %v460_v26 }
 0x932   :  { %v426_v29 = vpop.permute.xlu0 %425 }
 0x933   :  { %464 = vrot.lane.b32.xlu1 %v462_v27, %s1232_s1  ;;  %v428_v30 = vmul.f32 %v1128_v28, %v426_v29 }
 0x935   :  { %430 = vrot.lane.b32.xlu0 %v428_v30, %s1232_s1  ;;  %v1045_v30 = vld [vmem:[%s1546_s0 + $0xa] sm:$0x3] }
 0x9a5   :  { %v465_v32 = vpop.permute.xlu1 %464 }
 0x9a6   :  { %v1418_v33 = vadd.f32 %v465_v32, %v457_v31 }
 0x9a7   :  { %v431_v35 = vpop.permute.xlu0 %430 }
 0x9a8   :  { %1129 = vtanh.f32 %v1418_v33  ;;  %v1422_v37 = vadd.f32 %v431_v35, %v423_v34 }
 0x9aa   :  { %1131 = vtanh.f32 %v1422_v37 }
 0x9b5   :  { %v1130_v38 = vpop.eup %1129 }
 0x9b6   :  { %470 = vrot.lane.b32.xlu1 %v1130_v38, %s1231_s30 }
 0x9b7   :  { %v1132_v39 = vpop.eup %1131 }
 0x9b8   :  { %436 = vrot.lane.b32.xlu0 %v1132_v39, %s1231_s30 }
 0xa28   :  { %v471_v40 = vpop.permute.xlu1 %470 }
 0xa29   :  { %v473_v41 = vmul.f32 %v1126_v24, %v471_v40 }
 0xa2a   :  { %v437_v42 = vpop.permute.xlu0 %436 }
 0xa2b   :  { %475 = vrot.lane.b32.xlu0 %v473_v41, %s1232_s1  ;;  %v439_v43 = vmul.f32 %v1128_v28, %v437_v42 }
 0xa2d   :  { %479 = vrot.lane.b32.xlu1 %v439_v43, %s1231_s30 }
 0xa2f   :  { %557 = vperm.xlu0 %1063, %v1041_v44  }
 0xa9d   :  { %v476_v45 = vpop.permute.xlu0 %475 }
 0xa9f   :  { %v480_v46 = vpop.permute.xlu1 %479 }
 0xaa0   :  { %v482_v47 = vsel %vm95_vm0, %v476_v45, %v480_v46 }
 0xaa1   :  { %v483_v48 = vpack.c.bf16 %v482_v47, %v482_v47 }
 0xaa3   :  { %1039 = vmatmul.mubr.msk.bf16.vlgmr.msra.gmra.mxu1 %vm138_vm1, %v483_v48 }
 0xaa4   :  { %722 = vmatpush1.bf16.msra.mxu1 %v1292_v18  ;;  %745 = vmatprep.mubr.bf16.mxu1 %v1230_v0 }
 0xaa5   :  { %723 = vmatprep.subr.bf16.mxu1 %v1294_v19 }
 0xaa8   :  { %724 = vmatpush1.bf16.msra.mxu1 %v1299_v20 }
 0xaa9   :  { %725 = vmatprep.subr.bf16.mxu1 %v1303_v21 }
 0xaaa   :  { %v558_v49 = vpop.permute.xlu0 %557 }
 0xaab   :  { %v560_v50 = vmul.f32 %v1276_v2, %v558_v49 }
 0xaac   :  { %726 = vmatpush1.bf16.msra.mxu1 %v1307_v22 }
 0xaad   :  { %727 = vmatprep.subr.bf16.mxu1 %v1311_v23  ;;  %v561_v51 = vadd.f32 %v1281_v4, %v560_v50 }
 0xab0   :  { %728 = vmatpush1.bf16.msra.mxu1 %v1319_v25 }
 0xab1   :  { %947 = vmatprep.subr.bf16.mxu1 %v1290_v17 }
 0xb63   :  { %v521_v52 = vpop.f32.mrf.mxu1 }
 0xb64   :  { %v562_v53 = vadd.f32 %v561_v51, %v521_v52 }
 0xb65   :  { %v523_v54 = vpop.f32.mrf.mxu1 }
 0xb66   :  { %1133 = vtanh.f32 %v562_v53  ;;  %v528_v55 = vadd.f32 %v1345_v36, %v523_v54  ;;  %v1042_v17 = vmul.f32 -1.442695, %v562_v53 }
 0xb67   :  { %v525_v56 = vpop.f32.mrf.mxu1 }
 0xb68   :  { %1135 = vtanh.f32 %v528_v55  ;;  %v1040_v60 = vmul.f32 -1.442695, %v528_v55 }
 0xb69   :  { %v526_v57 = vpop.f32.mrf.mxu1  ;;  %1137 = vpow2.f32 %v1042_v17 }
 0xb6a   :  { %1139 = vpow2.f32 %v1040_v60 }
 0xb73   :  { %v1134_v58 = vpop.eup %1133 }
 0xb74   :  { %572 = vrot.lane.b32.xlu0 %v1134_v58, %s1231_s30 }
 0xb75   :  { %v1136_v59 = vpop.eup %1135 }
 0xb76   :  { %538 = vrot.lane.b32.xlu1 %v1136_v59, %s1231_s30  ;;  %v1138_v61 = vpop.eup %1137 }
 0xb77   :  { %v1140_v62 = vpop.eup %1139  ;;  %v566_v63 = vadd.f32 1.0, %v1138_v61 }
 0xb78   :  { %v532_v1 = vadd.f32 1.0, %v1140_v62 }
 0xb79   :  { %1141 = vrcp.f32 %v566_v63 }
 0xb7a   :  { %1143 = vrcp.f32 %v532_v1 }
 0xb86   :  { %v1142_v3 = vpop.eup %1141 }
 0xb87   :  { %v1144_v7 = vpop.eup %1143  ;;  %v570_v10 = vmul.f32 %v1142_v3, %v1418_v33 }
 0xb88   :  { %v536_v13 = vmul.f32 %v1144_v7, %v1422_v37 }
 0xbe6   :  { %v573_v5 = vpop.permute.xlu0 %572 }
 0xbe7   :  { %v575_v6 = vmul.f32 %v1142_v3, %v573_v5 }
 0xbe8   :  { %v539_v8 = vpop.permute.xlu1 %538 }
 0xbe9   :  { %577 = vrot.lane.b32.xlu0 %v575_v6, %s1232_s1  ;;  %v541_v9 = vmul.f32 %v1144_v7, %v539_v8 }
 0xbeb   :  { %543 = vrot.lane.b32.xlu1 %v541_v9, %s1232_s1  ;;  %v1049_v9 = vld [vmem:[%s1546_s0 + $0xc] sm:$0x3] }
 0xc5b   :  { %v578_v11 = vpop.permute.xlu0 %577 }
 0xc5c   :  { %v1451_v12 = vadd.f32 %v578_v11, %v570_v10 }
 0xc5d   :  { %v544_v14 = vpop.permute.xlu1 %543 }
 0xc5e   :  { %1145 = vtanh.f32 %v1451_v12  ;;  %v1455_v15 = vadd.f32 %v544_v14, %v536_v13 }
 0xc60   :  { %1147 = vtanh.f32 %v1455_v15 }
 0xc6b   :  { %v1146_v16 = vpop.eup %1145 }
 0xc6c   :  { %583 = vrot.lane.b32.xlu0 %v1146_v16, %s1231_s30 }
 0xc6d   :  { %v1148_v24 = vpop.eup %1147 }
 0xc6e   :  { %549 = vrot.lane.b32.xlu1 %v1148_v24, %s1231_s30 }
 0xcde   :  { %v584_v26 = vpop.permute.xlu0 %583 }
 0xcdf   :  { %v586_v27 = vmul.f32 %v1142_v3, %v584_v26 }
 0xce0   :  { %v550_v28 = vpop.permute.xlu1 %549 }
 0xce1   :  { %588 = vrot.lane.b32.xlu1 %v586_v27, %s1232_s1  ;;  %v552_v29 = vmul.f32 %v1144_v7, %v550_v28 }
 0xce3   :  { %592 = vrot.lane.b32.xlu0 %v552_v29, %s1231_s30 }
 0xce5   :  { %670 = vperm.xlu1 %1064, %v1045_v30  }
 0xd53   :  { %v589_v31 = vpop.permute.xlu1 %588 }
 0xd55   :  { %v593_v32 = vpop.permute.xlu0 %592 }
 0xd56   :  { %v595_v33 = vsel %vm95_vm0, %v589_v31, %v593_v32 }
 0xd57   :  { %v596_v34 = vpack.c.bf16 %v595_v33, %v595_v33 }
 0xd59   :  { %1043 = vmatmul.mubr.msk.bf16.vlgmr.msra.gmra.mxu0 %vm138_vm1, %v596_v34 }
 0xd5a   :  { %835 = vmatpush1.bf16.msra.mxu0 %v1292_v18  ;;  %858 = vmatprep.mubr.bf16.mxu0 %v1230_v0 }
 0xd5b   :  { %836 = vmatprep.subr.bf16.mxu0 %v1294_v19 }
 0xd5e   :  { %837 = vmatpush1.bf16.msra.mxu0 %v1299_v20 }
 0xd5f   :  { %838 = vmatprep.subr.bf16.mxu0 %v1303_v21 }
 0xd60   :  { %v671_v35 = vpop.permute.xlu1 %670 }
 0xd61   :  { %v673_v37 = vmul.f32 %v1276_v2, %v671_v35 }
 0xd62   :  { %839 = vmatpush1.bf16.msra.mxu0 %v1307_v22 }
 0xd63   :  { %840 = vmatprep.subr.bf16.mxu0 %v1311_v23  ;;  %v674_v38 = vadd.f32 %v1281_v4, %v673_v37 }
 0xd66   :  { %841 = vmatpush1.bf16.msra.mxu0 %v1319_v25 }
 0xe19   :  { %v634_v39 = vpop.f32.mrf.mxu0 }
 0xe1a   :  { %v675_v40 = vadd.f32 %v674_v38, %v634_v39 }
 0xe1b   :  { %v636_v41 = vpop.f32.mrf.mxu0 }
 0xe1c   :  { %1149 = vtanh.f32 %v675_v40  ;;  %v641_v42 = vadd.f32 %v1345_v36, %v636_v41  ;;  %v1046_v47 = vmul.f32 -1.442695, %v675_v40 }
 0xe1d   :  { %v638_v43 = vpop.f32.mrf.mxu0 }
 0xe1e   :  { %1151 = vtanh.f32 %v641_v42  ;;  %v1044_v48 = vmul.f32 -1.442695, %v641_v42 }
 0xe1f   :  { %v639_v44 = vpop.f32.mrf.mxu0  ;;  %1153 = vpow2.f32 %v1046_v47 }
 0xe20   :  { %1155 = vpow2.f32 %v1044_v48 }
 0xe29   :  { %v1150_v45 = vpop.eup %1149 }
 0xe2a   :  { %685 = vrot.lane.b32.xlu1 %v1150_v45, %s1231_s30 }
 0xe2b   :  { %v1152_v46 = vpop.eup %1151 }
 0xe2c   :  { %651 = vrot.lane.b32.xlu0 %v1152_v46, %s1231_s30  ;;  %v1154_v49 = vpop.eup %1153 }
 0xe2d   :  { %v1156_v50 = vpop.eup %1155  ;;  %v679_v51 = vadd.f32 1.0, %v1154_v49 }
 0xe2e   :  { %v645_v52 = vadd.f32 1.0, %v1156_v50  ;;  %v1053_v50 = vld [vmem:[%s1546_s0 + $0xe] sm:$0x3] }
 0xe2f   :  { %1157 = vrcp.f32 %v679_v51 }
 0xe30   :  { %1159 = vrcp.f32 %v645_v52 }
 0xe3c   :  { %v1158_v53 = vpop.eup %1157 }
 0xe3d   :  { %v1160_v56 = vpop.eup %1159  ;;  %v683_v59 = vmul.f32 %v1158_v53, %v1451_v12 }
 0xe3e   :  { %v649_v61 = vmul.f32 %v1160_v56, %v1455_v15 }
 0xe9c   :  { %v686_v54 = vpop.permute.xlu1 %685 }
 0xe9d   :  { %v688_v55 = vmul.f32 %v1158_v53, %v686_v54 }
 0xe9e   :  { %v652_v57 = vpop.permute.xlu0 %651 }
 0xe9f   :  { %690 = vrot.lane.b32.xlu1 %v688_v55, %s1232_s1  ;;  %v654_v58 = vmul.f32 %v1160_v56, %v652_v57 }
 0xea1   :  { %656 = vrot.lane.b32.xlu0 %v654_v58, %s1232_s1 }
 0xf11   :  { %v691_v17 = vpop.permute.xlu1 %690 }
 0xf12   :  { %v1483_v60 = vadd.f32 %v691_v17, %v683_v59 }
 0xf13   :  { %v657_v62 = vpop.permute.xlu0 %656 }
 0xf14   :  { %1161 = vtanh.f32 %v1483_v60  ;;  %v1487_v63 = vadd.f32 %v657_v62, %v649_v61 }
 0xf16   :  { %1163 = vtanh.f32 %v1487_v63 }
 0xf21   :  { %v1162_v1 = vpop.eup %1161 }
 0xf22   :  { %696 = vrot.lane.b32.xlu1 %v1162_v1, %s1231_s30 }
 0xf23   :  { %v1164_v3 = vpop.eup %1163 }
 0xf24   :  { %662 = vrot.lane.b32.xlu0 %v1164_v3, %s1231_s30 }
 0xf94   :  { %v697_v5 = vpop.permute.xlu1 %696 }
 0xf95   :  { %v699_v6 = vmul.f32 %v1158_v53, %v697_v5 }
 0xf96   :  { %v663_v7 = vpop.permute.xlu0 %662 }
 0xf97   :  { %701 = vrot.lane.b32.xlu0 %v699_v6, %s1232_s1  ;;  %v665_v8 = vmul.f32 %v1160_v56, %v663_v7 }
 0xf99   :  { %705 = vrot.lane.b32.xlu1 %v665_v8, %s1231_s30 }
 0xf9b   :  { %783 = vperm.xlu0 %1063, %v1049_v9  }
0x1009   :  { %v702_v10 = vpop.permute.xlu0 %701 }
0x100b   :  { %v706_v11 = vpop.permute.xlu1 %705 }
0x100c   :  { %v708_v12 = vsel %vm95_vm0, %v702_v10, %v706_v11 }
0x100d   :  { %v709_v13 = vpack.c.bf16 %v708_v12, %v708_v12 }
0x100f   :  { %1047 = vmatmul.mubr.msk.bf16.vlgmr.msra.gmra.mxu1 %vm138_vm1, %v709_v13 }
0x1010   :  { %948 = vmatpush1.bf16.msra.mxu1 %v1292_v18  ;;  %971 = vmatprep.mubr.bf16.mxu1 %v1230_v0 }
0x1011   :  { %949 = vmatprep.subr.bf16.mxu1 %v1294_v19 }
0x1014   :  { %950 = vmatpush1.bf16.msra.mxu1 %v1299_v20 }
0x1015   :  { %951 = vmatprep.subr.bf16.mxu1 %v1303_v21 }
0x1016   :  { %v784_v14 = vpop.permute.xlu0 %783 }
0x1017   :  { %v786_v15 = vmul.f32 %v1276_v2, %v784_v14 }
0x1018   :  { %952 = vmatpush1.bf16.msra.mxu1 %v1307_v22 }
0x1019   :  { %953 = vmatprep.subr.bf16.mxu1 %v1311_v23  ;;  %v787_v16 = vadd.f32 %v1281_v4, %v786_v15 }
0x101c   :  { %954 = vmatpush1.bf16.msra.mxu1 %v1319_v25 }
0x10cf   :  { %v747_v18 = vpop.f32.mrf.mxu1 }
0x10d0   :  { %v788_v24 = vadd.f32 %v787_v16, %v747_v18 }
0x10d1   :  { %v749_v0 = vpop.f32.mrf.mxu1 }
0x10d2   :  { %1165 = vtanh.f32 %v788_v24  ;;  %v754_v19 = vadd.f32 %v1345_v36, %v749_v0  ;;  %v1050_v23 = vmul.f32 -1.442695, %v788_v24 }
0x10d3   :  { %v751_v20 = vpop.f32.mrf.mxu1 }
0x10d4   :  { %1167 = vtanh.f32 %v754_v19  ;;  %v1048_v25 = vmul.f32 -1.442695, %v754_v19 }
0x10d5   :  { %v752_v21 = vpop.f32.mrf.mxu1  ;;  %1169 = vpow2.f32 %v1050_v23 }
0x10d6   :  { %1171 = vpow2.f32 %v1048_v25 }
0x10df   :  { %v1166_v26 = vpop.eup %1165 }
0x10e0   :  { %798 = vrot.lane.b32.xlu0 %v1166_v26, %s1231_s30 }
0x10e1   :  { %v1168_v22 = vpop.eup %1167 }
0x10e2   :  { %764 = vrot.lane.b32.xlu1 %v1168_v22, %s1231_s30  ;;  %v1170_v27 = vpop.eup %1169 }
0x10e3   :  { %v1172_v28 = vpop.eup %1171  ;;  %v792_v29 = vadd.f32 1.0, %v1170_v27 }
0x10e4   :  { %v758_v30 = vadd.f32 1.0, %v1172_v28 }
0x10e5   :  { %1173 = vrcp.f32 %v792_v29 }
0x10e6   :  { %1175 = vrcp.f32 %v758_v30 }
0x10f2   :  { %v1174_v31 = vpop.eup %1173 }
0x10f3   :  { %v1176_v34 = vpop.eup %1175  ;;  %v796_v38 = vmul.f32 %v1174_v31, %v1483_v60 }
0x10f4   :  { %v762_v41 = vmul.f32 %v1176_v34, %v1487_v63 }
0x1152   :  { %v799_v32 = vpop.permute.xlu0 %798 }
0x1153   :  { %v801_v33 = vmul.f32 %v1174_v31, %v799_v32 }
0x1154   :  { %v765_v35 = vpop.permute.xlu1 %764 }
0x1155   :  { %803 = vrot.lane.b32.xlu0 %v801_v33, %s1232_s1  ;;  %v767_v37 = vmul.f32 %v1176_v34, %v765_v35 }
0x1157   :  { %769 = vrot.lane.b32.xlu1 %v767_v37, %s1232_s1 }
0x11c7   :  { %v804_v39 = vpop.permute.xlu0 %803 }
0x11c8   :  { %v806_v40 = vadd.f32 %v804_v39, %v796_v38 }
0x11c9   :  { %v770_v42 = vpop.permute.xlu1 %769 }
0x11ca   :  { %1177 = vtanh.f32 %v806_v40  ;;  %v772_v43 = vadd.f32 %v770_v42, %v762_v41 }
0x11cc   :  { %1179 = vtanh.f32 %v772_v43 }
0x11d7   :  { %v1178_v44 = vpop.eup %1177 }
0x11d8   :  { %809 = vrot.lane.b32.xlu0 %v1178_v44, %s1231_s30 }
0x11d9   :  { %v1180_v45 = vpop.eup %1179 }
0x11da   :  { %775 = vrot.lane.b32.xlu1 %v1180_v45, %s1231_s30 }
0x124a   :  { %v810_v46 = vpop.permute.xlu0 %809 }
0x124b   :  { %v812_v47 = vmul.f32 %v1174_v31, %v810_v46 }
0x124c   :  { %v776_v48 = vpop.permute.xlu1 %775 }
0x124d   :  { %814 = vrot.lane.b32.xlu1 %v812_v47, %s1232_s1  ;;  %v778_v49 = vmul.f32 %v1176_v34, %v776_v48 }
0x124f   :  { %818 = vrot.lane.b32.xlu0 %v778_v49, %s1231_s30 }
0x1251   :  { %896 = vperm.xlu1 %1064, %v1053_v50  }
0x12bf   :  { %v815_v51 = vpop.permute.xlu1 %814 }
0x12c1   :  { %v819_v52 = vpop.permute.xlu0 %818 }
0x12c2   :  { %v821_v53 = vsel %vm95_vm0, %v815_v51, %v819_v52 }
0x12c3   :  { %v822_v54 = vpack.c.bf16 %v821_v53, %v821_v53 }
0x12c5   :  { %1051 = vmatmul.mubr.msk.bf16.vlgmr.msra.gmra.mxu0 %vm138_vm1, %v822_v54 }
0x12cc   :  { %v897_v55 = vpop.permute.xlu1 %896 }
0x12cd   :  { %v899_v56 = vmul.f32 %v1276_v2, %v897_v55 }
0x12cf   :  { %v900_v57 = vadd.f32 %v1281_v4, %v899_v56 }
0x1385   :  { %v860_v58 = vpop.f32.mrf.mxu0 }
0x1386   :  { %v901_v59 = vadd.f32 %v900_v57, %v860_v58 }
0x1387   :  { %v862_v17 = vpop.f32.mrf.mxu0 }
0x1388   :  { %1181 = vtanh.f32 %v901_v59  ;;  %v867_v60 = vadd.f32 %v1345_v36, %v862_v17  ;;  %v1054_v3 = vmul.f32 -1.442695, %v901_v59 }
0x1389   :  { %v864_v61 = vpop.f32.mrf.mxu0 }
0x138a   :  { %1183 = vtanh.f32 %v867_v60  ;;  %v1052_v5 = vmul.f32 -1.442695, %v867_v60 }
0x138b   :  { %v865_v62 = vpop.f32.mrf.mxu0  ;;  %1185 = vpow2.f32 %v1054_v3 }
0x138c   :  { %1187 = vpow2.f32 %v1052_v5 }
0x1395   :  { %v1182_v63 = vpop.eup %1181 }
0x1396   :  { %911 = vrot.lane.b32.xlu1 %v1182_v63, %s1231_s30 }
0x1397   :  { %v1184_v1 = vpop.eup %1183 }
0x1398   :  { %877 = vrot.lane.b32.xlu0 %v1184_v1, %s1231_s30  ;;  %v1186_v2 = vpop.eup %1185 }
0x1399   :  { %v1188_v4 = vpop.eup %1187  ;;  %v905_v6 = vadd.f32 1.0, %v1186_v2 }
0x139a   :  { %v871_v7 = vadd.f32 1.0, %v1188_v4 }
0x139b   :  { %1189 = vrcp.f32 %v905_v6 }
0x139c   :  { %1191 = vrcp.f32 %v871_v7 }
0x13a8   :  { %v1190_v8 = vpop.eup %1189 }
0x13a9   :  { %v1192_v11 = vpop.eup %1191  ;;  %v909_v14 = vmul.f32 %v1190_v8, %v806_v40 }
0x13aa   :  { %v875_v18 = vmul.f32 %v1192_v11, %v772_v43 }
0x1408   :  { %v912_v9 = vpop.permute.xlu1 %911 }
0x1409   :  { %v914_v10 = vmul.f32 %v1190_v8, %v912_v9 }
0x140a   :  { %v878_v12 = vpop.permute.xlu0 %877 }
0x140b   :  { %916 = vrot.lane.b32.xlu1 %v914_v10, %s1232_s1  ;;  %v880_v13 = vmul.f32 %v1192_v11, %v878_v12 }
0x140d   :  { %882 = vrot.lane.b32.xlu0 %v880_v13, %s1232_s1 }
0x147d   :  { %v917_v15 = vpop.permute.xlu1 %916 }
0x147e   :  { %v919_v16 = vadd.f32 %v917_v15, %v909_v14 }
0x147f   :  { %v883_v24 = vpop.permute.xlu0 %882 }
0x1480   :  { %1193 = vtanh.f32 %v919_v16  ;;  %v885_v0 = vadd.f32 %v883_v24, %v875_v18 }
0x1482   :  { %1195 = vtanh.f32 %v885_v0 }
0x148d   :  { %v1194_v19 = vpop.eup %1193 }
0x148e   :  { %922 = vrot.lane.b32.xlu1 %v1194_v19, %s1231_s30 }
0x148f   :  { %v1196_v20 = vpop.eup %1195 }
0x1490   :  { %888 = vrot.lane.b32.xlu0 %v1196_v20, %s1231_s30 }
0x1500   :  { %v923_v21 = vpop.permute.xlu1 %922 }
0x1501   :  { %v925_v26 = vmul.f32 %v1190_v8, %v923_v21 }
0x1502   :  { %v889_v22 = vpop.permute.xlu0 %888 }
0x1503   :  { %927 = vrot.lane.b32.xlu0 %v925_v26, %s1232_s1  ;;  %v891_v23 = vmul.f32 %v1192_v11, %v889_v22 }
0x1505   :  { %931 = vrot.lane.b32.xlu1 %v891_v23, %s1231_s30 }
0x1575   :  { %v928_v25 = vpop.permute.xlu0 %927 }
0x1577   :  { %v932_v27 = vpop.permute.xlu1 %931 }
0x1578   :  { %v934_v28 = vsel %vm95_vm0, %v928_v25, %v932_v27 }
0x1579   :  { %v935_v29 = vpack.c.bf16 %v934_v28, %v934_v28 }
0x157b   :  { %1055 = vmatmul.mubr.msk.bf16.vlgmr.msra.gmra.mxu1 %vm138_vm1, %v935_v29 }
0x163b   :  { %v973_v30 = vpop.f32.mrf.mxu1 }
0x163d   :  { %v974_v31 = vpop.f32.mrf.mxu1 }
0x163e   :  { %v979_v32 = vadd.f32 %v1345_v36, %v974_v31 }
0x163f   :  { %v976_v33 = vpop.f32.mrf.mxu1 }
0x1640   :  { %1197 = vtanh.f32 %v979_v32  ;;  %v1056_v37 = vmul.f32 -1.442695, %v979_v32 }
0x1641   :  { %v977_v34 = vpop.f32.mrf.mxu1 }
0x1642   :  { %1199 = vpow2.f32 %v1056_v37 }
0x164d   :  { %v1198_v35 = vpop.eup %1197 }
0x164e   :  { %989 = vrot.lane.b32.xlu0 %v1198_v35, %s1231_s30 }
0x164f   :  { %v1200_v38 = vpop.eup %1199 }
0x1650   :  { %v983_v39 = vadd.f32 1.0, %v1200_v38 }
0x1652   :  { %1201 = vrcp.f32 %v983_v39 }
0x165f   :  { %v1202_v40 = vpop.eup %1201 }
0x1660   :  { %v987_v43 = vmul.f32 %v1202_v40, %v885_v0 }
0x16c0   :  { %v990_v41 = vpop.permute.xlu0 %989 }
0x16c1   :  { %v992_v42 = vmul.f32 %v1202_v40, %v990_v41 }
0x16c3   :  { %994 = vrot.lane.b32.xlu1 %v992_v42, %s1232_s1 }
0x1735   :  { %v995_v44 = vpop.permute.xlu1 %994 }
0x1736   :  { %v997_v45 = vadd.f32 %v995_v44, %v987_v43 }
0x1738   :  { %1203 = vtanh.f32 %v997_v45 }
0x1745   :  { %v1204_v36 = vpop.eup %1203 }
0x1746   :  { %1000 = vrot.lane.b32.xlu0 %v1204_v36, %s1231_s30 }
0x17b8   :  { %v1001_v46 = vpop.permute.xlu0 %1000 }
0x17b9   :  { %v1003_v47 = vmul.f32 %v1202_v40, %v1001_v46 }
0x17bb   :  { %1005 = vrot.lane.b32.xlu1 %v1003_v47, %s1232_s1 }
0x182d   :  { %v1006_v48 = vpop.permute.xlu1 %1005 }
0x182e   :  { %1009 = vst.msk [vmem:[%s1551_s5] sm:$0x3] %vm1008_vm2, %v1006_v48 }
0x182f   :  { %1014 = vsyncpa [#allocation3], 1 }

</bundles_post_ra>
